<compile_context>
chip_gen: v7x
topology: tpu7x:2x2x1
jax: 0.10.0
libtpu: 0.0.40
codegen_flags: <defaults>
</compile_context>

<pallas_src>
import jax
import jax.numpy as jnp
from jax.experimental import pallas as pl
from jax.experimental.pallas import tpu as pltpu  # noqa: F401  (imported for TPU backend)

# ---------------- configuration (small, consistent with the module) ----------
B = 2            # batch
N = 8            # tokens (num_patches + 1 in ViT terms)
DIM = 32         # embedding dim
DEPTH = 2        # transformer depth
HEADS = 4
DIM_HEAD = 16
INNER = HEADS * DIM_HEAD         # 64
MLP_RATIO = 2
HIDDEN = DIM * MLP_RATIO         # 64
SCALE = DIM_HEAD ** (-0.5)
LN_EPS = 1e-5                    # PyTorch nn.LayerNorm default


def _gelu_tanh(z):
    # TODO(synk): PyTorch nn.GELU defaults to the exact erf form; the tanh
    # approximation is used here (and in the in-script reference) for a safe
    # Mosaic lowering. Difference is ~1e-3 absolute worst case.
    c = 0.7978845608028654  # sqrt(2/pi)
    return 0.5 * z * (1.0 + jnp.tanh(c * (z + 0.044715 * z * z * z)))


def _layer_norm(z, w, b):
    mu = jnp.mean(z, axis=-1, keepdims=True)
    zc = z - mu
    var = jnp.mean(zc * zc, axis=-1, keepdims=True)
    return zc * jax.lax.rsqrt(var + LN_EPS) * w + b


# ---------------- Pallas kernel ----------------------------------------------
def transformer_kernel(x_ref,
                       ln1w_ref, ln1b_ref, wqkv_ref, wout_ref, bout_ref,
                       ln2w_ref, ln2b_ref, w1_ref, b1_ref, w2_ref, b2_ref,
                       o_ref):
    # x_ref:    (B*N, DIM)                fused batch/token slab
    # ln*_ref:  (DEPTH, 1, DIM)           LayerNorm weight/bias
    # wqkv_ref: (DEPTH, DIM, 3*INNER)     pre-transposed to_qkv weight
    # wout_ref: (DEPTH, INNER, DIM)       pre-transposed to_out[0] weight
    # bout_ref: (DEPTH, 1, DIM)
    # w1_ref:   (DEPTH, DIM, HIDDEN)      pre-transposed MLP fc1 weight
    # b1_ref:   (DEPTH, 1, HIDDEN)
    # w2_ref:   (DEPTH, HIDDEN, DIM)      pre-transposed MLP fc2 weight
    # b2_ref:   (DEPTH, 1, DIM)
    # o_ref:    (B*N, DIM)
    x = x_ref[...].astype(jnp.float32)                               # (BN, DIM)

    for l in range(DEPTH):                                           # static unroll
        # ---------- PreNorm -> Attention -> residual ----------
        h = _layer_norm(x, ln1w_ref[l], ln1b_ref[l])                 # (BN, DIM)
        qkv = jnp.dot(h, wqkv_ref[l],
                      preferred_element_type=jnp.float32)            # (BN, 3*INNER)
        qkv = qkv.reshape(B, N, 3 * INNER)                           # per-batch view

        head_outs = []
        for hh in range(HEADS):                                      # static unroll
            q = qkv[:, :, hh * DIM_HEAD:(hh + 1) * DIM_HEAD]                 # (B,N,Dh)
            k = qkv[:, :, INNER + hh * DIM_HEAD:INNER + (hh + 1) * DIM_HEAD]
            v = qkv[:, :, 2 * INNER + hh * DIM_HEAD:2 * INNER + (hh + 1) * DIM_HEAD]

            dots = jnp.einsum('bnd,bmd->bnm', q, k,
                              preferred_element_type=jnp.float32) * SCALE    # (B,N,N)
            m = jnp.max(dots, axis=-1, keepdims=True)
            e = jnp.exp(dots - m)
            s = jnp.sum(e, axis=-1, keepdims=True)
            attn = e / s
            head_outs.append(
                jnp.einsum('bnm,bmd->bnd', attn, v,
                           preferred_element_type=jnp.float32))              # (B,N,Dh)

        attn_out = jnp.concatenate(head_outs, axis=-1).reshape(B * N, INNER)  # (BN, INNER)
        y = jnp.dot(attn_out, wout_ref[l],
                    preferred_element_type=jnp.float32) + bout_ref[l]         # (BN, DIM)
        x = x + y                                                    # residual

        # ---------- PreNorm -> FeedForward -> residual ----------
        h2 = _layer_norm(x, ln2w_ref[l], ln2b_ref[l])                # (BN, DIM)
        f = jnp.dot(h2, w1_ref[l],
                    preferred_element_type=jnp.float32) + b1_ref[l]  # (BN, HIDDEN)
        f = _gelu_tanh(f)
        f = jnp.dot(f, w2_ref[l],
                    preferred_element_type=jnp.float32) + b2_ref[l]  # (BN, DIM)
        x = x + f                                                    # residual

    o_ref[...] = x.astype(o_ref.dtype)


def transformer_forward(x, params):
    """x: (B, N, DIM) -> (B, N, DIM). Single fused Pallas call, no grid."""
    x2 = x.reshape(B * N, DIM)
    # Pre-transpose all Linear weights once in the wrapper (PyTorch stores
    # (out, in); MXU wants (in, out) as RHS).
    wqkv_t = jnp.transpose(params['wqkv'], (0, 2, 1))   # (L, DIM, 3*INNER)
    wout_t = jnp.transpose(params['wout'], (0, 2, 1))   # (L, INNER, DIM)
    w1_t = jnp.transpose(params['w1'], (0, 2, 1))       # (L, DIM, HIDDEN)
    w2_t = jnp.transpose(params['w2'], (0, 2, 1))       # (L, HIDDEN, DIM)

    out2 = pl.pallas_call(
        transformer_kernel,
        out_shape=jax.ShapeDtypeStruct((B * N, DIM), x.dtype),
        # No grid / BlockSpecs: the whole working set (< 200 KiB) lives in
        # VMEM for the single invocation, eliminating per-step grid overhead.
    )(
        x2,
        params['ln1_w'].reshape(DEPTH, 1, DIM),
        params['ln1_b'].reshape(DEPTH, 1, DIM),
        wqkv_t,
        wout_t,
        params['b_out'].reshape(DEPTH, 1, DIM),
        params['ln2_w'].reshape(DEPTH, 1, DIM),
        params['ln2_b'].reshape(DEPTH, 1, DIM),
        w1_t,
        params['b1'].reshape(DEPTH, 1, HIDDEN),
        w2_t,
        params['b2'].reshape(DEPTH, 1, DIM),
    )
    return out2.reshape(B, N, DIM)


# ---------------- deterministic parameter init (xavier_normal_, zero bias) ---
def xavier_normal(key, shape):
    fan_out, fan_in = shape               # nn.Linear weight is (out, in)
    std = (2.0 / (fan_in + fan_out)) ** 0.5
    return std * jax.random.normal(key, shape, dtype=jnp.float32)


# ---------------- plain-JAX reference (mirrors the PyTorch forward) ----------
def reference_forward(x, params):
    def layer_norm(z, w, b):
        mu = jnp.mean(z, axis=-1, keepdims=True)
        var = jnp.mean((z - mu) ** 2, axis=-1, keepdims=True)
        return (z - mu) / jnp.sqrt(var + LN_EPS) * w + b

    for l in range(DEPTH):
        # PreNorm + Attention + residual
        h = layer_norm(x, params['ln1_w'][l], params['ln1_b'][l])
        qkv = jnp.einsum('bnd,od->bno', h, params['wqkv'][l])        # (B,N,3*INNER)
        q, k, v = jnp.split(qkv, 3, axis=-1)

        def to_heads(t):
            return t.reshape(B, N, HEADS, DIM_HEAD).transpose(0, 2, 1, 3)

        q, k, v = map(to_heads, (q, k, v))
        dots = jnp.einsum('bhid,bhjd->bhij', q, k) * SCALE
        attn = jax.nn.softmax(dots, axis=-1)
        out = jnp.einsum('bhij,bhjd->bhid', attn, v)
        out = out.transpose(0, 2, 1, 3).reshape(B, N, INNER)
        y = jnp.einsum('bni,oi->bno', out, params['wout'][l]) + params['b_out'][l]
        x = x + y

        # PreNorm + FeedForward + residual
        h2 = layer_norm(x, params['ln2_w'][l], params['ln2_b'][l])
        f = jnp.einsum('bnd,hd->bnh', h2, params['w1'][l]) + params['b1'][l]
        f = _gelu_tanh(f)
        f = jnp.einsum('bnh,dh->bnd', f, params['w2'][l]) + params['b2'][l]
        x = x + f
    return x


if __name__ == "__main__":
    key = jax.random.PRNGKey(0)
    keys = jax.random.split(key, 1 + 4 * DEPTH)
    x = jax.random.normal(keys[0], (B, N, DIM), dtype=jnp.float32)

    wqkv = jnp.stack([xavier_normal(keys[1 + 4 * l + 0], (3 * INNER, DIM))
                      for l in range(DEPTH)])                        # to_qkv.weight
    wout = jnp.stack([xavier_normal(keys[1 + 4 * l + 1], (DIM, INNER))
                      for l in range(DEPTH)])                        # to_out[0].weight
    w1 = jnp.stack([xavier_normal(keys[1 + 4 * l + 2], (HIDDEN, DIM))
                    for l in range(DEPTH)])                          # MLP fc1.weight
    w2 = jnp.stack([xavier_normal(keys[1 + 4 * l + 3], (DIM, HIDDEN))
                    for l in range(DEPTH)])                          # MLP fc2.weight

    params = dict(
        ln1_w=jnp.ones((DEPTH, DIM), jnp.float32),
        ln1_b=jnp.zeros((DEPTH, DIM), jnp.float32),
        wqkv=wqkv,
        wout=wout,
        b_out=jnp.zeros((DEPTH, DIM), jnp.float32),
        ln2_w=jnp.ones((DEPTH, DIM), jnp.float32),
        ln2_b=jnp.zeros((DEPTH, DIM), jnp.float32),
        w1=w1,
        b1=jnp.zeros((DEPTH, HIDDEN), jnp.float32),
        w2=w2,
        b2=jnp.zeros((DEPTH, DIM), jnp.float32),
    )

    y = transformer_forward(x, params)
    y = jax.block_until_ready(y)

    y_ref = reference_forward(x, params)
    assert jnp.allclose(y, y_ref, atol=1e-4, rtol=1e-4), "mismatch vs reference"

    print("KERNEL_OK")
</pallas_src>

<mosaic_0001>
module attributes {stable_mosaic.version = 11 : i64} {
  func.func @transformer_kernel(%arg0: memref<16x32xf32, #tpu.memory_space<vmem>>, %arg1: memref<2x1x32xf32, #tpu.memory_space<vmem>>, %arg2: memref<2x1x32xf32, #tpu.memory_space<vmem>>, %arg3: memref<2x32x192xf32, #tpu.memory_space<vmem>>, %arg4: memref<2x64x32xf32, #tpu.memory_space<vmem>>, %arg5: memref<2x1x32xf32, #tpu.memory_space<vmem>>, %arg6: memref<2x1x32xf32, #tpu.memory_space<vmem>>, %arg7: memref<2x1x32xf32, #tpu.memory_space<vmem>>, %arg8: memref<2x32x64xf32, #tpu.memory_space<vmem>>, %arg9: memref<2x1x64xf32, #tpu.memory_space<vmem>>, %arg10: memref<2x64x32xf32, #tpu.memory_space<vmem>>, %arg11: memref<2x1x32xf32, #tpu.memory_space<vmem>>, %arg12: memref<16x32xf32, #tpu.memory_space<vmem>>) attributes {dimension_semantics = [], scalar_prefetch = 0 : i64, scratch_operands = 0 : i64, tpu.core_type = #tpu.core_type<tc>} {
    %c0 = arith.constant 0 : index
    %c0_0 = arith.constant 0 : index
    %0 = vector.load %arg0[%c0, %c0_0] : memref<16x32xf32, #tpu.memory_space<vmem>>, vector<16x32xf32>
    %c0_1 = arith.constant 0 : index
    %c0_2 = arith.constant 0 : index
    %c0_3 = arith.constant 0 : index
    %1 = vector.load %arg1[%c0_1, %c0_2, %c0_3] : memref<2x1x32xf32, #tpu.memory_space<vmem>>, vector<1x1x32xf32>
    %2 = vector.shape_cast %1 : vector<1x1x32xf32> to vector<1x32xf32>
    %c0_4 = arith.constant 0 : index
    %c0_5 = arith.constant 0 : index
    %c0_6 = arith.constant 0 : index
    %3 = vector.load %arg2[%c0_4, %c0_5, %c0_6] : memref<2x1x32xf32, #tpu.memory_space<vmem>>, vector<1x1x32xf32>
    %4 = vector.shape_cast %3 : vector<1x1x32xf32> to vector<1x32xf32>
    %cst = arith.constant dense<0.000000e+00> : vector<16xf32>
    %5 = vector.multi_reduction <add>, %0, %cst [1] : vector<16x32xf32> to vector<16xf32>
    %6 = vector.shape_cast %5 : vector<16xf32> to vector<16x1xf32>
    %cst_7 = arith.constant 3.200000e+01 : f32
    %7 = vector.broadcast %cst_7 : f32 to vector<16x1xf32>
    %8 = arith.divf %6, %7 : vector<16x1xf32>
    %9 = vector.broadcast %8 : vector<16x1xf32> to vector<16x32xf32>
    %10 = arith.subf %0, %9 : vector<16x32xf32>
    %11 = arith.mulf %10, %10 : vector<16x32xf32>
    %cst_8 = arith.constant dense<0.000000e+00> : vector<16xf32>
    %12 = vector.multi_reduction <add>, %11, %cst_8 [1] : vector<16x32xf32> to vector<16xf32>
    %13 = vector.shape_cast %12 : vector<16xf32> to vector<16x1xf32>
    %cst_9 = arith.constant 3.200000e+01 : f32
    %14 = vector.broadcast %cst_9 : f32 to vector<16x1xf32>
    %15 = arith.divf %13, %14 : vector<16x1xf32>
    %cst_10 = arith.constant 9.99999974E-6 : f32
    %16 = vector.broadcast %cst_10 : f32 to vector<16x1xf32>
    %17 = arith.addf %15, %16 : vector<16x1xf32>
    %18 = math.rsqrt %17 : vector<16x1xf32>
    %19 = vector.broadcast %18 : vector<16x1xf32> to vector<16x32xf32>
    %20 = arith.mulf %10, %19 : vector<16x32xf32>
    %21 = vector.broadcast %2 : vector<1x32xf32> to vector<16x32xf32>
    %22 = arith.mulf %20, %21 : vector<16x32xf32>
    %23 = vector.broadcast %4 : vector<1x32xf32> to vector<16x32xf32>
    %24 = arith.addf %22, %23 : vector<16x32xf32>
    %c0_11 = arith.constant 0 : index
    %c0_12 = arith.constant 0 : index
    %c0_13 = arith.constant 0 : index
    %25 = vector.load %arg3[%c0_11, %c0_12, %c0_13] : memref<2x32x192xf32, #tpu.memory_space<vmem>>, vector<1x32x192xf32>
    %26 = vector.shape_cast %25 : vector<1x32x192xf32> to vector<32x192xf32>
    %cst_14 = arith.constant dense<0.000000e+00> : vector<16x192xf32>
    %27 = tpu.matmul %24, %26, %cst_14 {dimension_numbers = #tpu.dot_dimension_numbers<[1], [0], [0], [1], [0, 0, 1, 1], [], []>} : vector<16x32xf32>, vector<32x192xf32>, vector<16x192xf32> -> vector<16x192xf32>
    %28 = vector.shape_cast %27 : vector<16x192xf32> to vector<2x8x192xf32>
    %29 = vector.extract_strided_slice %28 {offsets = [0, 0, 0], sizes = [2, 8, 16], strides = [1, 1, 1]} : vector<2x8x192xf32> to vector<2x8x16xf32>
    %30 = vector.extract_strided_slice %28 {offsets = [0, 0, 64], sizes = [2, 8, 16], strides = [1, 1, 1]} : vector<2x8x192xf32> to vector<2x8x16xf32>
    %31 = vector.extract_strided_slice %28 {offsets = [0, 0, 128], sizes = [2, 8, 16], strides = [1, 1, 1]} : vector<2x8x192xf32> to vector<2x8x16xf32>
    "tpu.trace_start"() <{level = 10 : i32, message = "bnd,bmd->bnm"}> : () -> ()
    %cst_15 = arith.constant dense<0.000000e+00> : vector<2x8x8xf32>
    %32 = tpu.matmul %29, %30, %cst_15 {dimension_numbers = #tpu.dot_dimension_numbers<[2], [2], [1], [1], [0, 0, 0, 1, 1, 1], [0], [0]>} : vector<2x8x16xf32>, vector<2x8x16xf32>, vector<2x8x8xf32> -> vector<2x8x8xf32>
    "tpu.trace_stop"() : () -> ()
    %cst_16 = arith.constant 2.500000e-01 : f32
    %33 = vector.broadcast %cst_16 : f32 to vector<2x8x8xf32>
    %34 = arith.mulf %32, %33 : vector<2x8x8xf32>
    %cst_17 = arith.constant dense<0xFF800000> : vector<2x8xf32>
    %35 = vector.multi_reduction <maximumf>, %34, %cst_17 [2] : vector<2x8x8xf32> to vector<2x8xf32>
    %36 = vector.shape_cast %35 : vector<2x8xf32> to vector<2x8x1xf32>
    %37 = vector.broadcast %36 : vector<2x8x1xf32> to vector<2x8x8xf32>
    %38 = arith.subf %34, %37 : vector<2x8x8xf32>
    %39 = math.exp %38 : vector<2x8x8xf32>
    %cst_18 = arith.constant dense<0.000000e+00> : vector<2x8xf32>
    %40 = vector.multi_reduction <add>, %39, %cst_18 [2] : vector<2x8x8xf32> to vector<2x8xf32>
    %41 = vector.shape_cast %40 : vector<2x8xf32> to vector<2x8x1xf32>
    %42 = vector.broadcast %41 : vector<2x8x1xf32> to vector<2x8x8xf32>
    %43 = arith.divf %39, %42 : vector<2x8x8xf32>
    "tpu.trace_start"() <{level = 10 : i32, message = "bnm,bmd->bnd"}> : () -> ()
    %cst_19 = arith.constant dense<0.000000e+00> : vector<2x8x16xf32>
    %44 = tpu.matmul %43, %31, %cst_19 {dimension_numbers = #tpu.dot_dimension_numbers<[2], [1], [1], [2], [0, 0, 0, 1, 1, 2], [0], [0]>} : vector<2x8x8xf32>, vector<2x8x16xf32>, vector<2x8x16xf32> -> vector<2x8x16xf32>
    "tpu.trace_stop"() : () -> ()
    %45 = vector.extract_strided_slice %28 {offsets = [0, 0, 16], sizes = [2, 8, 16], strides = [1, 1, 1]} : vector<2x8x192xf32> to vector<2x8x16xf32>
    %46 = vector.extract_strided_slice %28 {offsets = [0, 0, 80], sizes = [2, 8, 16], strides = [1, 1, 1]} : vector<2x8x192xf32> to vector<2x8x16xf32>
    %47 = vector.extract_strided_slice %28 {offsets = [0, 0, 144], sizes = [2, 8, 16], strides = [1, 1, 1]} : vector<2x8x192xf32> to vector<2x8x16xf32>
    "tpu.trace_start"() <{level = 10 : i32, message = "bnd,bmd->bnm"}> : () -> ()
    %cst_20 = arith.constant dense<0.000000e+00> : vector<2x8x8xf32>
    %48 = tpu.matmul %45, %46, %cst_20 {dimension_numbers = #tpu.dot_dimension_numbers<[2], [2], [1], [1], [0, 0, 0, 1, 1, 1], [0], [0]>} : vector<2x8x16xf32>, vector<2x8x16xf32>, vector<2x8x8xf32> -> vector<2x8x8xf32>
    "tpu.trace_stop"() : () -> ()
    %cst_21 = arith.constant 2.500000e-01 : f32
    %49 = vector.broadcast %cst_21 : f32 to vector<2x8x8xf32>
    %50 = arith.mulf %48, %49 : vector<2x8x8xf32>
    %cst_22 = arith.constant dense<0xFF800000> : vector<2x8xf32>
    %51 = vector.multi_reduction <maximumf>, %50, %cst_22 [2] : vector<2x8x8xf32> to vector<2x8xf32>
    %52 = vector.shape_cast %51 : vector<2x8xf32> to vector<2x8x1xf32>
    %53 = vector.broadcast %52 : vector<2x8x1xf32> to vector<2x8x8xf32>
    %54 = arith.subf %50, %53 : vector<2x8x8xf32>
    %55 = math.exp %54 : vector<2x8x8xf32>
    %cst_23 = arith.constant dense<0.000000e+00> : vector<2x8xf32>
    %56 = vector.multi_reduction <add>, %55, %cst_23 [2] : vector<2x8x8xf32> to vector<2x8xf32>
    %57 = vector.shape_cast %56 : vector<2x8xf32> to vector<2x8x1xf32>
    %58 = vector.broadcast %57 : vector<2x8x1xf32> to vector<2x8x8xf32>
    %59 = arith.divf %55, %58 : vector<2x8x8xf32>
    "tpu.trace_start"() <{level = 10 : i32, message = "bnm,bmd->bnd"}> : () -> ()
    %cst_24 = arith.constant dense<0.000000e+00> : vector<2x8x16xf32>
    %60 = tpu.matmul %59, %47, %cst_24 {dimension_numbers = #tpu.dot_dimension_numbers<[2], [1], [1], [2], [0, 0, 0, 1, 1, 2], [0], [0]>} : vector<2x8x8xf32>, vector<2x8x16xf32>, vector<2x8x16xf32> -> vector<2x8x16xf32>
    "tpu.trace_stop"() : () -> ()
    %61 = vector.extract_strided_slice %28 {offsets = [0, 0, 32], sizes = [2, 8, 16], strides = [1, 1, 1]} : vector<2x8x192xf32> to vector<2x8x16xf32>
    %62 = vector.extract_strided_slice %28 {offsets = [0, 0, 96], sizes = [2, 8, 16], strides = [1, 1, 1]} : vector<2x8x192xf32> to vector<2x8x16xf32>
    %63 = vector.extract_strided_slice %28 {offsets = [0, 0, 160], sizes = [2, 8, 16], strides = [1, 1, 1]} : vector<2x8x192xf32> to vector<2x8x16xf32>
    "tpu.trace_start"() <{level = 10 : i32, message = "bnd,bmd->bnm"}> : () -> ()
    %cst_25 = arith.constant dense<0.000000e+00> : vector<2x8x8xf32>
    %64 = tpu.matmul %61, %62, %cst_25 {dimension_numbers = #tpu.dot_dimension_numbers<[2], [2], [1], [1], [0, 0, 0, 1, 1, 1], [0], [0]>} : vector<2x8x16xf32>, vector<2x8x16xf32>, vector<2x8x8xf32> -> vector<2x8x8xf32>
    "tpu.trace_stop"() : () -> ()
    %cst_26 = arith.constant 2.500000e-01 : f32
    %65 = vector.broadcast %cst_26 : f32 to vector<2x8x8xf32>
    %66 = arith.mulf %64, %65 : vector<2x8x8xf32>
    %cst_27 = arith.constant dense<0xFF800000> : vector<2x8xf32>
    %67 = vector.multi_reduction <maximumf>, %66, %cst_27 [2] : vector<2x8x8xf32> to vector<2x8xf32>
    %68 = vector.shape_cast %67 : vector<2x8xf32> to vector<2x8x1xf32>
    %69 = vector.broadcast %68 : vector<2x8x1xf32> to vector<2x8x8xf32>
    %70 = arith.subf %66, %69 : vector<2x8x8xf32>
    %71 = math.exp %70 : vector<2x8x8xf32>
    %cst_28 = arith.constant dense<0.000000e+00> : vector<2x8xf32>
    %72 = vector.multi_reduction <add>, %71, %cst_28 [2] : vector<2x8x8xf32> to vector<2x8xf32>
    %73 = vector.shape_cast %72 : vector<2x8xf32> to vector<2x8x1xf32>
    %74 = vector.broadcast %73 : vector<2x8x1xf32> to vector<2x8x8xf32>
    %75 = arith.divf %71, %74 : vector<2x8x8xf32>
    "tpu.trace_start"() <{level = 10 : i32, message = "bnm,bmd->bnd"}> : () -> ()
    %cst_29 = arith.constant dense<0.000000e+00> : vector<2x8x16xf32>
    %76 = tpu.matmul %75, %63, %cst_29 {dimension_numbers = #tpu.dot_dimension_numbers<[2], [1], [1], [2], [0, 0, 0, 1, 1, 2], [0], [0]>} : vector<2x8x8xf32>, vector<2x8x16xf32>, vector<2x8x16xf32> -> vector<2x8x16xf32>
    "tpu.trace_stop"() : () -> ()
    %77 = vector.extract_strided_slice %28 {offsets = [0, 0, 48], sizes = [2, 8, 16], strides = [1, 1, 1]} : vector<2x8x192xf32> to vector<2x8x16xf32>
    %78 = vector.extract_strided_slice %28 {offsets = [0, 0, 112], sizes = [2, 8, 16], strides = [1, 1, 1]} : vector<2x8x192xf32> to vector<2x8x16xf32>
    %79 = vector.extract_strided_slice %28 {offsets = [0, 0, 176], sizes = [2, 8, 16], strides = [1, 1, 1]} : vector<2x8x192xf32> to vector<2x8x16xf32>
    "tpu.trace_start"() <{level = 10 : i32, message = "bnd,bmd->bnm"}> : () -> ()
    %cst_30 = arith.constant dense<0.000000e+00> : vector<2x8x8xf32>
    %80 = tpu.matmul %77, %78, %cst_30 {dimension_numbers = #tpu.dot_dimension_numbers<[2], [2], [1], [1], [0, 0, 0, 1, 1, 1], [0], [0]>} : vector<2x8x16xf32>, vector<2x8x16xf32>, vector<2x8x8xf32> -> vector<2x8x8xf32>
    "tpu.trace_stop"() : () -> ()
    %cst_31 = arith.constant 2.500000e-01 : f32
    %81 = vector.broadcast %cst_31 : f32 to vector<2x8x8xf32>
    %82 = arith.mulf %80, %81 : vector<2x8x8xf32>
    %cst_32 = arith.constant dense<0xFF800000> : vector<2x8xf32>
    %83 = vector.multi_reduction <maximumf>, %82, %cst_32 [2] : vector<2x8x8xf32> to vector<2x8xf32>
    %84 = vector.shape_cast %83 : vector<2x8xf32> to vector<2x8x1xf32>
    %85 = vector.broadcast %84 : vector<2x8x1xf32> to vector<2x8x8xf32>
    %86 = arith.subf %82, %85 : vector<2x8x8xf32>
    %87 = math.exp %86 : vector<2x8x8xf32>
    %cst_33 = arith.constant dense<0.000000e+00> : vector<2x8xf32>
    %88 = vector.multi_reduction <add>, %87, %cst_33 [2] : vector<2x8x8xf32> to vector<2x8xf32>
    %89 = vector.shape_cast %88 : vector<2x8xf32> to vector<2x8x1xf32>
    %90 = vector.broadcast %89 : vector<2x8x1xf32> to vector<2x8x8xf32>
    %91 = arith.divf %87, %90 : vector<2x8x8xf32>
    "tpu.trace_start"() <{level = 10 : i32, message = "bnm,bmd->bnd"}> : () -> ()
    %cst_34 = arith.constant dense<0.000000e+00> : vector<2x8x16xf32>
    %92 = tpu.matmul %91, %79, %cst_34 {dimension_numbers = #tpu.dot_dimension_numbers<[2], [1], [1], [2], [0, 0, 0, 1, 1, 2], [0], [0]>} : vector<2x8x8xf32>, vector<2x8x16xf32>, vector<2x8x16xf32> -> vector<2x8x16xf32>
    "tpu.trace_stop"() : () -> ()
    %93 = tpu.concatenate %44, %60, %76, %92 in 2 : vector<2x8x16xf32>, vector<2x8x16xf32>, vector<2x8x16xf32>, vector<2x8x16xf32> -> vector<2x8x64xf32>
    %94 = vector.shape_cast %93 : vector<2x8x64xf32> to vector<16x64xf32>
    %c0_35 = arith.constant 0 : index
    %c0_36 = arith.constant 0 : index
    %c0_37 = arith.constant 0 : index
    %95 = vector.load %arg4[%c0_35, %c0_36, %c0_37] : memref<2x64x32xf32, #tpu.memory_space<vmem>>, vector<1x64x32xf32>
    %96 = vector.shape_cast %95 : vector<1x64x32xf32> to vector<64x32xf32>
    %cst_38 = arith.constant dense<0.000000e+00> : vector<16x32xf32>
    %97 = tpu.matmul %94, %96, %cst_38 {dimension_numbers = #tpu.dot_dimension_numbers<[1], [0], [0], [1], [0, 0, 1, 1], [], []>} : vector<16x64xf32>, vector<64x32xf32>, vector<16x32xf32> -> vector<16x32xf32>
    %c0_39 = arith.constant 0 : index
    %c0_40 = arith.constant 0 : index
    %c0_41 = arith.constant 0 : index
    %98 = vector.load %arg5[%c0_39, %c0_40, %c0_41] : memref<2x1x32xf32, #tpu.memory_space<vmem>>, vector<1x1x32xf32>
    %99 = vector.shape_cast %98 : vector<1x1x32xf32> to vector<1x32xf32>
    %100 = vector.broadcast %99 : vector<1x32xf32> to vector<16x32xf32>
    %101 = arith.addf %97, %100 : vector<16x32xf32>
    %102 = arith.addf %0, %101 : vector<16x32xf32>
    %c0_42 = arith.constant 0 : index
    %c0_43 = arith.constant 0 : index
    %c0_44 = arith.constant 0 : index
    %103 = vector.load %arg6[%c0_42, %c0_43, %c0_44] : memref<2x1x32xf32, #tpu.memory_space<vmem>>, vector<1x1x32xf32>
    %104 = vector.shape_cast %103 : vector<1x1x32xf32> to vector<1x32xf32>
    %c0_45 = arith.constant 0 : index
    %c0_46 = arith.constant 0 : index
    %c0_47 = arith.constant 0 : index
    %105 = vector.load %arg7[%c0_45, %c0_46, %c0_47] : memref<2x1x32xf32, #tpu.memory_space<vmem>>, vector<1x1x32xf32>
    %106 = vector.shape_cast %105 : vector<1x1x32xf32> to vector<1x32xf32>
    %cst_48 = arith.constant dense<0.000000e+00> : vector<16xf32>
    %107 = vector.multi_reduction <add>, %102, %cst_48 [1] : vector<16x32xf32> to vector<16xf32>
    %108 = vector.shape_cast %107 : vector<16xf32> to vector<16x1xf32>
    %cst_49 = arith.constant 3.200000e+01 : f32
    %109 = vector.broadcast %cst_49 : f32 to vector<16x1xf32>
    %110 = arith.divf %108, %109 : vector<16x1xf32>
    %111 = vector.broadcast %110 : vector<16x1xf32> to vector<16x32xf32>
    %112 = arith.subf %102, %111 : vector<16x32xf32>
    %113 = arith.mulf %112, %112 : vector<16x32xf32>
    %cst_50 = arith.constant dense<0.000000e+00> : vector<16xf32>
    %114 = vector.multi_reduction <add>, %113, %cst_50 [1] : vector<16x32xf32> to vector<16xf32>
    %115 = vector.shape_cast %114 : vector<16xf32> to vector<16x1xf32>
    %cst_51 = arith.constant 3.200000e+01 : f32
    %116 = vector.broadcast %cst_51 : f32 to vector<16x1xf32>
    %117 = arith.divf %115, %116 : vector<16x1xf32>
    %cst_52 = arith.constant 9.99999974E-6 : f32
    %118 = vector.broadcast %cst_52 : f32 to vector<16x1xf32>
    %119 = arith.addf %117, %118 : vector<16x1xf32>
    %120 = math.rsqrt %119 : vector<16x1xf32>
    %121 = vector.broadcast %120 : vector<16x1xf32> to vector<16x32xf32>
    %122 = arith.mulf %112, %121 : vector<16x32xf32>
    %123 = vector.broadcast %104 : vector<1x32xf32> to vector<16x32xf32>
    %124 = arith.mulf %122, %123 : vector<16x32xf32>
    %125 = vector.broadcast %106 : vector<1x32xf32> to vector<16x32xf32>
    %126 = arith.addf %124, %125 : vector<16x32xf32>
    %c0_53 = arith.constant 0 : index
    %c0_54 = arith.constant 0 : index
    %c0_55 = arith.constant 0 : index
    %127 = vector.load %arg8[%c0_53, %c0_54, %c0_55] : memref<2x32x64xf32, #tpu.memory_space<vmem>>, vector<1x32x64xf32>
    %128 = vector.shape_cast %127 : vector<1x32x64xf32> to vector<32x64xf32>
    %cst_56 = arith.constant dense<0.000000e+00> : vector<16x64xf32>
    %129 = tpu.matmul %126, %128, %cst_56 {dimension_numbers = #tpu.dot_dimension_numbers<[1], [0], [0], [1], [0, 0, 1, 1], [], []>} : vector<16x32xf32>, vector<32x64xf32>, vector<16x64xf32> -> vector<16x64xf32>
    %c0_57 = arith.constant 0 : index
    %c0_58 = arith.constant 0 : index
    %c0_59 = arith.constant 0 : index
    %130 = vector.load %arg9[%c0_57, %c0_58, %c0_59] : memref<2x1x64xf32, #tpu.memory_space<vmem>>, vector<1x1x64xf32>
    %131 = vector.shape_cast %130 : vector<1x1x64xf32> to vector<1x64xf32>
    %132 = vector.broadcast %131 : vector<1x64xf32> to vector<16x64xf32>
    %133 = arith.addf %129, %132 : vector<16x64xf32>
    %cst_60 = arith.constant 5.000000e-01 : f32
    %134 = vector.broadcast %cst_60 : f32 to vector<16x64xf32>
    %135 = arith.mulf %134, %133 : vector<16x64xf32>
    %cst_61 = arith.constant 4.471500e-02 : f32
    %136 = vector.broadcast %cst_61 : f32 to vector<16x64xf32>
    %137 = arith.mulf %136, %133 : vector<16x64xf32>
    %138 = arith.mulf %137, %133 : vector<16x64xf32>
    %139 = arith.mulf %138, %133 : vector<16x64xf32>
    %140 = arith.addf %133, %139 : vector<16x64xf32>
    %cst_62 = arith.constant 0.797884583 : f32
    %141 = vector.broadcast %cst_62 : f32 to vector<16x64xf32>
    %142 = arith.mulf %141, %140 : vector<16x64xf32>
    %143 = math.tanh %142 : vector<16x64xf32>
    %cst_63 = arith.constant 1.000000e+00 : f32
    %144 = vector.broadcast %cst_63 : f32 to vector<16x64xf32>
    %145 = arith.addf %144, %143 : vector<16x64xf32>
    %146 = arith.mulf %135, %145 : vector<16x64xf32>
    %c0_64 = arith.constant 0 : index
    %c0_65 = arith.constant 0 : index
    %c0_66 = arith.constant 0 : index
    %147 = vector.load %arg10[%c0_64, %c0_65, %c0_66] : memref<2x64x32xf32, #tpu.memory_space<vmem>>, vector<1x64x32xf32>
    %148 = vector.shape_cast %147 : vector<1x64x32xf32> to vector<64x32xf32>
    %cst_67 = arith.constant dense<0.000000e+00> : vector<16x32xf32>
    %149 = tpu.matmul %146, %148, %cst_67 {dimension_numbers = #tpu.dot_dimension_numbers<[1], [0], [0], [1], [0, 0, 1, 1], [], []>} : vector<16x64xf32>, vector<64x32xf32>, vector<16x32xf32> -> vector<16x32xf32>
    %c0_68 = arith.constant 0 : index
    %c0_69 = arith.constant 0 : index
    %c0_70 = arith.constant 0 : index
    %150 = vector.load %arg11[%c0_68, %c0_69, %c0_70] : memref<2x1x32xf32, #tpu.memory_space<vmem>>, vector<1x1x32xf32>
    %151 = vector.shape_cast %150 : vector<1x1x32xf32> to vector<1x32xf32>
    %152 = vector.broadcast %151 : vector<1x32xf32> to vector<16x32xf32>
    %153 = arith.addf %149, %152 : vector<16x32xf32>
    %154 = arith.addf %102, %153 : vector<16x32xf32>
    %c1 = arith.constant 1 : index
    %c0_71 = arith.constant 0 : index
    %c0_72 = arith.constant 0 : index
    %155 = vector.load %arg1[%c1, %c0_71, %c0_72] : memref<2x1x32xf32, #tpu.memory_space<vmem>>, vector<1x1x32xf32>
    %156 = vector.shape_cast %155 : vector<1x1x32xf32> to vector<1x32xf32>
    %c1_73 = arith.constant 1 : index
    %c0_74 = arith.constant 0 : index
    %c0_75 = arith.constant 0 : index
    %157 = vector.load %arg2[%c1_73, %c0_74, %c0_75] : memref<2x1x32xf32, #tpu.memory_space<vmem>>, vector<1x1x32xf32>
    %158 = vector.shape_cast %157 : vector<1x1x32xf32> to vector<1x32xf32>
    %cst_76 = arith.constant dense<0.000000e+00> : vector<16xf32>
    %159 = vector.multi_reduction <add>, %154, %cst_76 [1] : vector<16x32xf32> to vector<16xf32>
    %160 = vector.shape_cast %159 : vector<16xf32> to vector<16x1xf32>
    %cst_77 = arith.constant 3.200000e+01 : f32
    %161 = vector.broadcast %cst_77 : f32 to vector<16x1xf32>
    %162 = arith.divf %160, %161 : vector<16x1xf32>
    %163 = vector.broadcast %162 : vector<16x1xf32> to vector<16x32xf32>
    %164 = arith.subf %154, %163 : vector<16x32xf32>
    %165 = arith.mulf %164, %164 : vector<16x32xf32>
    %cst_78 = arith.constant dense<0.000000e+00> : vector<16xf32>
    %166 = vector.multi_reduction <add>, %165, %cst_78 [1] : vector<16x32xf32> to vector<16xf32>
    %167 = vector.shape_cast %166 : vector<16xf32> to vector<16x1xf32>
    %cst_79 = arith.constant 3.200000e+01 : f32
    %168 = vector.broadcast %cst_79 : f32 to vector<16x1xf32>
    %169 = arith.divf %167, %168 : vector<16x1xf32>
    %cst_80 = arith.constant 9.99999974E-6 : f32
    %170 = vector.broadcast %cst_80 : f32 to vector<16x1xf32>
    %171 = arith.addf %169, %170 : vector<16x1xf32>
    %172 = math.rsqrt %171 : vector<16x1xf32>
    %173 = vector.broadcast %172 : vector<16x1xf32> to vector<16x32xf32>
    %174 = arith.mulf %164, %173 : vector<16x32xf32>
    %175 = vector.broadcast %156 : vector<1x32xf32> to vector<16x32xf32>
    %176 = arith.mulf %174, %175 : vector<16x32xf32>
    %177 = vector.broadcast %158 : vector<1x32xf32> to vector<16x32xf32>
    %178 = arith.addf %176, %177 : vector<16x32xf32>
    %c1_81 = arith.constant 1 : index
    %c0_82 = arith.constant 0 : index
    %c0_83 = arith.constant 0 : index
    %179 = vector.load %arg3[%c1_81, %c0_82, %c0_83] : memref<2x32x192xf32, #tpu.memory_space<vmem>>, vector<1x32x192xf32>
    %180 = vector.shape_cast %179 : vector<1x32x192xf32> to vector<32x192xf32>
    %cst_84 = arith.constant dense<0.000000e+00> : vector<16x192xf32>
    %181 = tpu.matmul %178, %180, %cst_84 {dimension_numbers = #tpu.dot_dimension_numbers<[1], [0], [0], [1], [0, 0, 1, 1], [], []>} : vector<16x32xf32>, vector<32x192xf32>, vector<16x192xf32> -> vector<16x192xf32>
    %182 = vector.shape_cast %181 : vector<16x192xf32> to vector<2x8x192xf32>
    %183 = vector.extract_strided_slice %182 {offsets = [0, 0, 0], sizes = [2, 8, 16], strides = [1, 1, 1]} : vector<2x8x192xf32> to vector<2x8x16xf32>
    %184 = vector.extract_strided_slice %182 {offsets = [0, 0, 64], sizes = [2, 8, 16], strides = [1, 1, 1]} : vector<2x8x192xf32> to vector<2x8x16xf32>
    %185 = vector.extract_strided_slice %182 {offsets = [0, 0, 128], sizes = [2, 8, 16], strides = [1, 1, 1]} : vector<2x8x192xf32> to vector<2x8x16xf32>
    "tpu.trace_start"() <{level = 10 : i32, message = "bnd,bmd->bnm"}> : () -> ()
    %cst_85 = arith.constant dense<0.000000e+00> : vector<2x8x8xf32>
    %186 = tpu.matmul %183, %184, %cst_85 {dimension_numbers = #tpu.dot_dimension_numbers<[2], [2], [1], [1], [0, 0, 0, 1, 1, 1], [0], [0]>} : vector<2x8x16xf32>, vector<2x8x16xf32>, vector<2x8x8xf32> -> vector<2x8x8xf32>
    "tpu.trace_stop"() : () -> ()
    %cst_86 = arith.constant 2.500000e-01 : f32
    %187 = vector.broadcast %cst_86 : f32 to vector<2x8x8xf32>
    %188 = arith.mulf %186, %187 : vector<2x8x8xf32>
    %cst_87 = arith.constant dense<0xFF800000> : vector<2x8xf32>
    %189 = vector.multi_reduction <maximumf>, %188, %cst_87 [2] : vector<2x8x8xf32> to vector<2x8xf32>
    %190 = vector.shape_cast %189 : vector<2x8xf32> to vector<2x8x1xf32>
    %191 = vector.broadcast %190 : vector<2x8x1xf32> to vector<2x8x8xf32>
    %192 = arith.subf %188, %191 : vector<2x8x8xf32>
    %193 = math.exp %192 : vector<2x8x8xf32>
    %cst_88 = arith.constant dense<0.000000e+00> : vector<2x8xf32>
    %194 = vector.multi_reduction <add>, %193, %cst_88 [2] : vector<2x8x8xf32> to vector<2x8xf32>
    %195 = vector.shape_cast %194 : vector<2x8xf32> to vector<2x8x1xf32>
    %196 = vector.broadcast %195 : vector<2x8x1xf32> to vector<2x8x8xf32>
    %197 = arith.divf %193, %196 : vector<2x8x8xf32>
    "tpu.trace_start"() <{level = 10 : i32, message = "bnm,bmd->bnd"}> : () -> ()
    %cst_89 = arith.constant dense<0.000000e+00> : vector<2x8x16xf32>
    %198 = tpu.matmul %197, %185, %cst_89 {dimension_numbers = #tpu.dot_dimension_numbers<[2], [1], [1], [2], [0, 0, 0, 1, 1, 2], [0], [0]>} : vector<2x8x8xf32>, vector<2x8x16xf32>, vector<2x8x16xf32> -> vector<2x8x16xf32>
    "tpu.trace_stop"() : () -> ()
    %199 = vector.extract_strided_slice %182 {offsets = [0, 0, 16], sizes = [2, 8, 16], strides = [1, 1, 1]} : vector<2x8x192xf32> to vector<2x8x16xf32>
    %200 = vector.extract_strided_slice %182 {offsets = [0, 0, 80], sizes = [2, 8, 16], strides = [1, 1, 1]} : vector<2x8x192xf32> to vector<2x8x16xf32>
    %201 = vector.extract_strided_slice %182 {offsets = [0, 0, 144], sizes = [2, 8, 16], strides = [1, 1, 1]} : vector<2x8x192xf32> to vector<2x8x16xf32>
    "tpu.trace_start"() <{level = 10 : i32, message = "bnd,bmd->bnm"}> : () -> ()
    %cst_90 = arith.constant dense<0.000000e+00> : vector<2x8x8xf32>
    %202 = tpu.matmul %199, %200, %cst_90 {dimension_numbers = #tpu.dot_dimension_numbers<[2], [2], [1], [1], [0, 0, 0, 1, 1, 1], [0], [0]>} : vector<2x8x16xf32>, vector<2x8x16xf32>, vector<2x8x8xf32> -> vector<2x8x8xf32>
    "tpu.trace_stop"() : () -> ()
    %cst_91 = arith.constant 2.500000e-01 : f32
    %203 = vector.broadcast %cst_91 : f32 to vector<2x8x8xf32>
    %204 = arith.mulf %202, %203 : vector<2x8x8xf32>
    %cst_92 = arith.constant dense<0xFF800000> : vector<2x8xf32>
    %205 = vector.multi_reduction <maximumf>, %204, %cst_92 [2] : vector<2x8x8xf32> to vector<2x8xf32>
    %206 = vector.shape_cast %205 : vector<2x8xf32> to vector<2x8x1xf32>
    %207 = vector.broadcast %206 : vector<2x8x1xf32> to vector<2x8x8xf32>
    %208 = arith.subf %204, %207 : vector<2x8x8xf32>
    %209 = math.exp %208 : vector<2x8x8xf32>
    %cst_93 = arith.constant dense<0.000000e+00> : vector<2x8xf32>
    %210 = vector.multi_reduction <add>, %209, %cst_93 [2] : vector<2x8x8xf32> to vector<2x8xf32>
    %211 = vector.shape_cast %210 : vector<2x8xf32> to vector<2x8x1xf32>
    %212 = vector.broadcast %211 : vector<2x8x1xf32> to vector<2x8x8xf32>
    %213 = arith.divf %209, %212 : vector<2x8x8xf32>
    "tpu.trace_start"() <{level = 10 : i32, message = "bnm,bmd->bnd"}> : () -> ()
    %cst_94 = arith.constant dense<0.000000e+00> : vector<2x8x16xf32>
    %214 = tpu.matmul %213, %201, %cst_94 {dimension_numbers = #tpu.dot_dimension_numbers<[2], [1], [1], [2], [0, 0, 0, 1, 1, 2], [0], [0]>} : vector<2x8x8xf32>, vector<2x8x16xf32>, vector<2x8x16xf32> -> vector<2x8x16xf32>
    "tpu.trace_stop"() : () -> ()
    %215 = vector.extract_strided_slice %182 {offsets = [0, 0, 32], sizes = [2, 8, 16], strides = [1, 1, 1]} : vector<2x8x192xf32> to vector<2x8x16xf32>
    %216 = vector.extract_strided_slice %182 {offsets = [0, 0, 96], sizes = [2, 8, 16], strides = [1, 1, 1]} : vector<2x8x192xf32> to vector<2x8x16xf32>
    %217 = vector.extract_strided_slice %182 {offsets = [0, 0, 160], sizes = [2, 8, 16], strides = [1, 1, 1]} : vector<2x8x192xf32> to vector<2x8x16xf32>
    "tpu.trace_start"() <{level = 10 : i32, message = "bnd,bmd->bnm"}> : () -> ()
    %cst_95 = arith.constant dense<0.000000e+00> : vector<2x8x8xf32>
    %218 = tpu.matmul %215, %216, %cst_95 {dimension_numbers = #tpu.dot_dimension_numbers<[2], [2], [1], [1], [0, 0, 0, 1, 1, 1], [0], [0]>} : vector<2x8x16xf32>, vector<2x8x16xf32>, vector<2x8x8xf32> -> vector<2x8x8xf32>
    "tpu.trace_stop"() : () -> ()
    %cst_96 = arith.constant 2.500000e-01 : f32
    %219 = vector.broadcast %cst_96 : f32 to vector<2x8x8xf32>
    %220 = arith.mulf %218, %219 : vector<2x8x8xf32>
    %cst_97 = arith.constant dense<0xFF800000> : vector<2x8xf32>
    %221 = vector.multi_reduction <maximumf>, %220, %cst_97 [2] : vector<2x8x8xf32> to vector<2x8xf32>
    %222 = vector.shape_cast %221 : vector<2x8xf32> to vector<2x8x1xf32>
    %223 = vector.broadcast %222 : vector<2x8x1xf32> to vector<2x8x8xf32>
    %224 = arith.subf %220, %223 : vector<2x8x8xf32>
    %225 = math.exp %224 : vector<2x8x8xf32>
    %cst_98 = arith.constant dense<0.000000e+00> : vector<2x8xf32>
    %226 = vector.multi_reduction <add>, %225, %cst_98 [2] : vector<2x8x8xf32> to vector<2x8xf32>
    %227 = vector.shape_cast %226 : vector<2x8xf32> to vector<2x8x1xf32>
    %228 = vector.broadcast %227 : vector<2x8x1xf32> to vector<2x8x8xf32>
    %229 = arith.divf %225, %228 : vector<2x8x8xf32>
    "tpu.trace_start"() <{level = 10 : i32, message = "bnm,bmd->bnd"}> : () -> ()
    %cst_99 = arith.constant dense<0.000000e+00> : vector<2x8x16xf32>
    %230 = tpu.matmul %229, %217, %cst_99 {dimension_numbers = #tpu.dot_dimension_numbers<[2], [1], [1], [2], [0, 0, 0, 1, 1, 2], [0], [0]>} : vector<2x8x8xf32>, vector<2x8x16xf32>, vector<2x8x16xf32> -> vector<2x8x16xf32>
    "tpu.trace_stop"() : () -> ()
    %231 = vector.extract_strided_slice %182 {offsets = [0, 0, 48], sizes = [2, 8, 16], strides = [1, 1, 1]} : vector<2x8x192xf32> to vector<2x8x16xf32>
    %232 = vector.extract_strided_slice %182 {offsets = [0, 0, 112], sizes = [2, 8, 16], strides = [1, 1, 1]} : vector<2x8x192xf32> to vector<2x8x16xf32>
    %233 = vector.extract_strided_slice %182 {offsets = [0, 0, 176], sizes = [2, 8, 16], strides = [1, 1, 1]} : vector<2x8x192xf32> to vector<2x8x16xf32>
    "tpu.trace_start"() <{level = 10 : i32, message = "bnd,bmd->bnm"}> : () -> ()
    %cst_100 = arith.constant dense<0.000000e+00> : vector<2x8x8xf32>
    %234 = tpu.matmul %231, %232, %cst_100 {dimension_numbers = #tpu.dot_dimension_numbers<[2], [2], [1], [1], [0, 0, 0, 1, 1, 1], [0], [0]>} : vector<2x8x16xf32>, vector<2x8x16xf32>, vector<2x8x8xf32> -> vector<2x8x8xf32>
    "tpu.trace_stop"() : () -> ()
    %cst_101 = arith.constant 2.500000e-01 : f32
    %235 = vector.broadcast %cst_101 : f32 to vector<2x8x8xf32>
    %236 = arith.mulf %234, %235 : vector<2x8x8xf32>
    %cst_102 = arith.constant dense<0xFF800000> : vector<2x8xf32>
    %237 = vector.multi_reduction <maximumf>, %236, %cst_102 [2] : vector<2x8x8xf32> to vector<2x8xf32>
    %238 = vector.shape_cast %237 : vector<2x8xf32> to vector<2x8x1xf32>
    %239 = vector.broadcast %238 : vector<2x8x1xf32> to vector<2x8x8xf32>
    %240 = arith.subf %236, %239 : vector<2x8x8xf32>
    %241 = math.exp %240 : vector<2x8x8xf32>
    %cst_103 = arith.constant dense<0.000000e+00> : vector<2x8xf32>
    %242 = vector.multi_reduction <add>, %241, %cst_103 [2] : vector<2x8x8xf32> to vector<2x8xf32>
    %243 = vector.shape_cast %242 : vector<2x8xf32> to vector<2x8x1xf32>
    %244 = vector.broadcast %243 : vector<2x8x1xf32> to vector<2x8x8xf32>
    %245 = arith.divf %241, %244 : vector<2x8x8xf32>
    "tpu.trace_start"() <{level = 10 : i32, message = "bnm,bmd->bnd"}> : () -> ()
    %cst_104 = arith.constant dense<0.000000e+00> : vector<2x8x16xf32>
    %246 = tpu.matmul %245, %233, %cst_104 {dimension_numbers = #tpu.dot_dimension_numbers<[2], [1], [1], [2], [0, 0, 0, 1, 1, 2], [0], [0]>} : vector<2x8x8xf32>, vector<2x8x16xf32>, vector<2x8x16xf32> -> vector<2x8x16xf32>
    "tpu.trace_stop"() : () -> ()
    %247 = tpu.concatenate %198, %214, %230, %246 in 2 : vector<2x8x16xf32>, vector<2x8x16xf32>, vector<2x8x16xf32>, vector<2x8x16xf32> -> vector<2x8x64xf32>
    %248 = vector.shape_cast %247 : vector<2x8x64xf32> to vector<16x64xf32>
    %c1_105 = arith.constant 1 : index
    %c0_106 = arith.constant 0 : index
    %c0_107 = arith.constant 0 : index
    %249 = vector.load %arg4[%c1_105, %c0_106, %c0_107] : memref<2x64x32xf32, #tpu.memory_space<vmem>>, vector<1x64x32xf32>
    %250 = vector.shape_cast %249 : vector<1x64x32xf32> to vector<64x32xf32>
    %cst_108 = arith.constant dense<0.000000e+00> : vector<16x32xf32>
    %251 = tpu.matmul %248, %250, %cst_108 {dimension_numbers = #tpu.dot_dimension_numbers<[1], [0], [0], [1], [0, 0, 1, 1], [], []>} : vector<16x64xf32>, vector<64x32xf32>, vector<16x32xf32> -> vector<16x32xf32>
    %c1_109 = arith.constant 1 : index
    %c0_110 = arith.constant 0 : index
    %c0_111 = arith.constant 0 : index
    %252 = vector.load %arg5[%c1_109, %c0_110, %c0_111] : memref<2x1x32xf32, #tpu.memory_space<vmem>>, vector<1x1x32xf32>
    %253 = vector.shape_cast %252 : vector<1x1x32xf32> to vector<1x32xf32>
    %254 = vector.broadcast %253 : vector<1x32xf32> to vector<16x32xf32>
    %255 = arith.addf %251, %254 : vector<16x32xf32>
    %256 = arith.addf %154, %255 : vector<16x32xf32>
    %c1_112 = arith.constant 1 : index
    %c0_113 = arith.constant 0 : index
    %c0_114 = arith.constant 0 : index
    %257 = vector.load %arg6[%c1_112, %c0_113, %c0_114] : memref<2x1x32xf32, #tpu.memory_space<vmem>>, vector<1x1x32xf32>
    %258 = vector.shape_cast %257 : vector<1x1x32xf32> to vector<1x32xf32>
    %c1_115 = arith.constant 1 : index
    %c0_116 = arith.constant 0 : index
    %c0_117 = arith.constant 0 : index
    %259 = vector.load %arg7[%c1_115, %c0_116, %c0_117] : memref<2x1x32xf32, #tpu.memory_space<vmem>>, vector<1x1x32xf32>
    %260 = vector.shape_cast %259 : vector<1x1x32xf32> to vector<1x32xf32>
    %cst_118 = arith.constant dense<0.000000e+00> : vector<16xf32>
    %261 = vector.multi_reduction <add>, %256, %cst_118 [1] : vector<16x32xf32> to vector<16xf32>
    %262 = vector.shape_cast %261 : vector<16xf32> to vector<16x1xf32>
    %cst_119 = arith.constant 3.200000e+01 : f32
    %263 = vector.broadcast %cst_119 : f32 to vector<16x1xf32>
    %264 = arith.divf %262, %263 : vector<16x1xf32>
    %265 = vector.broadcast %264 : vector<16x1xf32> to vector<16x32xf32>
    %266 = arith.subf %256, %265 : vector<16x32xf32>
    %267 = arith.mulf %266, %266 : vector<16x32xf32>
    %cst_120 = arith.constant dense<0.000000e+00> : vector<16xf32>
    %268 = vector.multi_reduction <add>, %267, %cst_120 [1] : vector<16x32xf32> to vector<16xf32>
    %269 = vector.shape_cast %268 : vector<16xf32> to vector<16x1xf32>
    %cst_121 = arith.constant 3.200000e+01 : f32
    %270 = vector.broadcast %cst_121 : f32 to vector<16x1xf32>
    %271 = arith.divf %269, %270 : vector<16x1xf32>
    %cst_122 = arith.constant 9.99999974E-6 : f32
    %272 = vector.broadcast %cst_122 : f32 to vector<16x1xf32>
    %273 = arith.addf %271, %272 : vector<16x1xf32>
    %274 = math.rsqrt %273 : vector<16x1xf32>
    %275 = vector.broadcast %274 : vector<16x1xf32> to vector<16x32xf32>
    %276 = arith.mulf %266, %275 : vector<16x32xf32>
    %277 = vector.broadcast %258 : vector<1x32xf32> to vector<16x32xf32>
    %278 = arith.mulf %276, %277 : vector<16x32xf32>
    %279 = vector.broadcast %260 : vector<1x32xf32> to vector<16x32xf32>
    %280 = arith.addf %278, %279 : vector<16x32xf32>
    %c1_123 = arith.constant 1 : index
    %c0_124 = arith.constant 0 : index
    %c0_125 = arith.constant 0 : index
    %281 = vector.load %arg8[%c1_123, %c0_124, %c0_125] : memref<2x32x64xf32, #tpu.memory_space<vmem>>, vector<1x32x64xf32>
    %282 = vector.shape_cast %281 : vector<1x32x64xf32> to vector<32x64xf32>
    %cst_126 = arith.constant dense<0.000000e+00> : vector<16x64xf32>
    %283 = tpu.matmul %280, %282, %cst_126 {dimension_numbers = #tpu.dot_dimension_numbers<[1], [0], [0], [1], [0, 0, 1, 1], [], []>} : vector<16x32xf32>, vector<32x64xf32>, vector<16x64xf32> -> vector<16x64xf32>
    %c1_127 = arith.constant 1 : index
    %c0_128 = arith.constant 0 : index
    %c0_129 = arith.constant 0 : index
    %284 = vector.load %arg9[%c1_127, %c0_128, %c0_129] : memref<2x1x64xf32, #tpu.memory_space<vmem>>, vector<1x1x64xf32>
    %285 = vector.shape_cast %284 : vector<1x1x64xf32> to vector<1x64xf32>
    %286 = vector.broadcast %285 : vector<1x64xf32> to vector<16x64xf32>
    %287 = arith.addf %283, %286 : vector<16x64xf32>
    %cst_130 = arith.constant 5.000000e-01 : f32
    %288 = vector.broadcast %cst_130 : f32 to vector<16x64xf32>
    %289 = arith.mulf %288, %287 : vector<16x64xf32>
    %cst_131 = arith.constant 4.471500e-02 : f32
    %290 = vector.broadcast %cst_131 : f32 to vector<16x64xf32>
    %291 = arith.mulf %290, %287 : vector<16x64xf32>
    %292 = arith.mulf %291, %287 : vector<16x64xf32>
    %293 = arith.mulf %292, %287 : vector<16x64xf32>
    %294 = arith.addf %287, %293 : vector<16x64xf32>
    %cst_132 = arith.constant 0.797884583 : f32
    %295 = vector.broadcast %cst_132 : f32 to vector<16x64xf32>
    %296 = arith.mulf %295, %294 : vector<16x64xf32>
    %297 = math.tanh %296 : vector<16x64xf32>
    %cst_133 = arith.constant 1.000000e+00 : f32
    %298 = vector.broadcast %cst_133 : f32 to vector<16x64xf32>
    %299 = arith.addf %298, %297 : vector<16x64xf32>
    %300 = arith.mulf %289, %299 : vector<16x64xf32>
    %c1_134 = arith.constant 1 : index
    %c0_135 = arith.constant 0 : index
    %c0_136 = arith.constant 0 : index
    %301 = vector.load %arg10[%c1_134, %c0_135, %c0_136] : memref<2x64x32xf32, #tpu.memory_space<vmem>>, vector<1x64x32xf32>
    %302 = vector.shape_cast %301 : vector<1x64x32xf32> to vector<64x32xf32>
    %cst_137 = arith.constant dense<0.000000e+00> : vector<16x32xf32>
    %303 = tpu.matmul %300, %302, %cst_137 {dimension_numbers = #tpu.dot_dimension_numbers<[1], [0], [0], [1], [0, 0, 1, 1], [], []>} : vector<16x64xf32>, vector<64x32xf32>, vector<16x32xf32> -> vector<16x32xf32>
    %c1_138 = arith.constant 1 : index
    %c0_139 = arith.constant 0 : index
    %c0_140 = arith.constant 0 : index
    %304 = vector.load %arg11[%c1_138, %c0_139, %c0_140] : memref<2x1x32xf32, #tpu.memory_space<vmem>>, vector<1x1x32xf32>
    %305 = vector.shape_cast %304 : vector<1x1x32xf32> to vector<1x32xf32>
    %306 = vector.broadcast %305 : vector<1x32xf32> to vector<16x32xf32>
    %307 = arith.addf %303, %306 : vector<16x32xf32>
    %308 = arith.addf %256, %307 : vector<16x32xf32>
    %c0_141 = arith.constant 0 : index
    %c0_142 = arith.constant 0 : index
    %309 = vector.load %arg12[%c0_141, %c0_142] : memref<16x32xf32, #tpu.memory_space<vmem>>, vector<16x32xf32>
    tpu.vector_store %arg12[%c0_141, %c0_142], %308 {strides = array<i32>} : memref<16x32xf32, #tpu.memory_space<vmem>>, vector<16x32xf32>,
    return
  }
}

</mosaic_0001>

<bundles_post_ra>
// kernel: tpu_custom_call.1
= control target key start
LH: loop header
LB: loop body
LE: loop exit
PB: predicated region body
PF: predicated region fallthrough
CT: control target
= control target key end

     0   :  { %vm46_vm0 = vcmask 261120   ;;  %s5171_s0 = inlined_call_operand.vmem [shape: f32[16,32], index: 0, kind: input, shape index: {}]   ;;  %s5172_s1 = inlined_call_operand.vmem [shape: f32[2,1,32], index: 1, kind: input, shape index: {}]   ;;  %s5173_s2 = inlined_call_operand.vmem [shape: f32[2,1,32], index: 2, kind: input, shape index: {}]   ;;  %s5174_s3 = inlined_call_operand.vmem [shape: f32[2,32,192], index: 3, kind: input, shape index: {}]   ;;  %s5175_s4 = inlined_call_operand.vmem [shape: f32[2,64,32], index: 4, kind: input, shape index: {}]   ;;  %s5176_s5 = inlined_call_operand.vmem [shape: f32[2,1,32], index: 5, kind: input, shape index: {}]   ;;  %s5177_s6 = inlined_call_operand.vmem [shape: f32[2,1,32], index: 6, kind: input, shape index: {}]   ;;  %s5178_s7 = inlined_call_operand.vmem [shape: f32[2,1,32], index: 7, kind: input, shape index: {}]   ;;  %s5179_s8 = inlined_call_operand.vmem [shape: f32[2,32,64], index: 8, kind: input, shape index: {}]   ;;  %s5180_s9 = inlined_call_operand.vmem [shape: f32[2,1,64], index: 9, kind: input, shape index: {}]   ;;  %s5181_s10 = inlined_call_operand.vmem [shape: f32[2,64,32], index: 10, kind: input, shape index: {}]   ;;  %s5182_s11 = inlined_call_operand.vmem [shape: f32[2,1,32], index: 11, kind: input, shape index: {}]   ;;  %s5183_s12 = inlined_call_operand.hbm [shape: f32[16,32], index: 12, kind: output, shape index: {}]  }
   0x1   :  { %v4540_v0 = vld [vmem:[%s5171_s0] sm:$0xff]  ;;  %v4545_v1 = vld [vmem:[%s5171_s0 + $0x8] sm:$0xff] }
   0x2   :  { %17 = vsyncpa [#allocation3], 0  ;;  %v47_v2 = vsel %vm46_vm0, %v4540_v0, 0.0  ;;  %v50_v3 = vsel %vm46_vm0, %v4545_v1, 0.0  ;;  %v91_v14 = vld [vmem:[%s5174_s3 + $0x8] sm:$0xff]  ;;  %v93_v15 = vld [vmem:[%s5174_s3 + $0x18] sm:$0xff] }
   0x3   :  { %48 = vadd.xlane.f32.xlu0 %v47_v2  ;;  %v90_v16 = vld [vmem:[%s5174_s3] sm:$0xff]  ;;  %v4240_v17 = vpack.c.bf16 %v93_v15, %v91_v14  ;;  %v92_v18 = vld [vmem:[%s5174_s3 + $0x10] sm:$0xff]  ;;  %v95_v19 = vld [vmem:[%s5174_s3 + $0x28] sm:$0xff]  ;;  %v4460_v21 = vmov 0.0   ;;  %vm4461_vm1 = vmmov 0   ;;  %s4462_s25 = smov 64  }
   0x4   :  { %v97_v20 = vld [vmem:[%s5174_s3 + $0x38] sm:$0xff]  ;;  %168 = vmatprep.mubr.f32.mxu0 %v4460_v21  ;;  %3987 = vmatprep.subr.mxu1 %v4460_v21  ;;  %v4242_v22 = vpack.c.bf16 %v92_v18, %v90_v16  ;;  %v94_v24 = vld [vmem:[%s5174_s3 + $0x20] sm:$0xff]  ;;  %v96_v25 = vld [vmem:[%s5174_s3 + $0x30] sm:$0xff]  ;;  %vm184_vm2 = vcmask 130048   ;;  %vm338_vm3 = vcmask 64512   ;;  %s4463_s26 = smov 48  }
   0x5   :  { %v4244_v23 = vpack.c.bf16 %v97_v20, %v95_v19  ;;  %4241 = vmatprep.subr.bf16.mxu0 %v4240_v17  ;;  %v4246_v26 = vpack.c.bf16 %v96_v25, %v94_v24  ;;  %v3753_v34 = vld [vmem:[%s5172_s1] ss:$0 sm:$0xff]  ;;  %3989 = vmatprep.mubr.msk.f32.mxu1 %vm4461_vm1, %v4460_v21  ;;  %s4464_s27 = smov 112   ;;  %s4465_s28 = smov 32   ;;  %vm1533_vm4 = vcmask 392192   ;;  %vm1551_vm5 = vcmask 523264  }
   0x6   :  { %4243 = vmatpush1.bf16.msra.mxu0 %v4242_v22  ;;  %v3754_v36 = vld [vmem:[%s5173_s2] ss:$0 sm:$0xff]  ;;  %s4466_s29 = smov 96   ;;  %s4467_s30 = smov 16  }
   0x7   :  { %51 = vadd.xlane.f32.xlu0 %v50_v3  ;;  %4245 = vmatprep.subr.bf16.mxu0 %v4244_v23  ;;  %s4468_s13 = smov 80   ;;  %s4469_s21 = smov [#allocation2]  }
   0xa   :  { %4247 = vmatpush1.bf16.msra.mxu0 %v4246_v26 }
   0xb   :  { %3982 = vmatprep.subr.mxu0 %v4460_v21 }
  0x90   :  { %v49_v4 = vpop.xlane.xlu0 %48 }
  0x91   :  { %v54_v5 = vmul.f32 0.03125, %v49_v4 }
  0x93   :  { %v56_v6 = vsub.f32 %v4540_v0, %v54_v5 }
  0x94   :  { %v52_v7 = vpop.xlane.xlu0 %51 }
  0x95   :  { %v55_v8 = vmul.f32 0.03125, %v52_v7  ;;  %v58_v9 = vmul.f32 %v56_v6, %v56_v6 }
  0x97   :  { %v57_v10 = vsub.f32 %v4545_v1, %v55_v8  ;;  %v60_v11 = vsel %vm46_vm0, %v58_v9, 0.0 }
  0x98   :  { %61 = vadd.xlane.f32.xlu1 %v60_v11 }
  0x99   :  { %v59_v12 = vmul.f32 %v57_v10, %v57_v10 }
  0x9b   :  { %v63_v13 = vsel %vm46_vm0, %v59_v12, 0.0 }
  0x9c   :  { %64 = vadd.xlane.f32.xlu1 %v63_v13 }
 0x125   :  { %v62_v27 = vpop.xlane.xlu1 %61 }
 0x126   :  { %v66_v28 = vmul.f32 0.03125, %v62_v27 }
 0x128   :  { %v68_v29 = vadd.f32 1e-05, %v66_v28 }
 0x129   :  { %v65_v30 = vpop.xlane.xlu1 %64 }
 0x12a   :  { %4348 = vrsqrt.f32 %v68_v29  ;;  %v67_v31 = vmul.f32 0.03125, %v65_v30 }
 0x12c   :  { %v69_v32 = vadd.f32 1e-05, %v67_v31 }
 0x12e   :  { %4350 = vrsqrt.f32 %v69_v32 }
 0x134   :  { %v4349_v33 = vpop.eup %4348 }
 0x135   :  { %v72_v35 = vmul.f32 %v4349_v33, %v56_v6 }
 0x137   :  { %v80_v37 = vmul.f32 %v3753_v34, %v72_v35 }
 0x138   :  { %v4351_v38 = vpop.eup %4350 }
 0x139   :  { %v88_v39 = vadd.f32 %v3754_v36, %v80_v37  ;;  %v73_v40 = vmul.f32 %v4351_v38, %v57_v10 }
 0x13b   :  { %3755 = vmatmul.mubr.msk.f32.vlgmr.msra.gmra.mrb[0].mxu0 %vm46_vm0, %v88_v39  ;;  %v81_v41 = vmul.f32 %v3753_v34, %v73_v40 }
 0x13c   :  { %174 = vmatprep.mubr.f32.mxu0 %v4460_v21 }
 0x13d   :  { %v89_v42 = vadd.f32 %v3754_v36, %v81_v41 }
 0x13f   :  { %3756 = vmatmul.mubr.msk.f32.gmra.mrb[2].mxu0 %vm46_vm0, %v89_v42 }
 0x140   :  { %3984 = vmatprep.mubr.msk.f32.mxu0 %vm4461_vm1, %v4460_v21 }
 0x20e   :  { %v4595_v43 = vpop.f32.mrb[0].mxu0 }
 0x20f   :  { %182 = vrot.lane.b32.xlu0 %v4595_v43, %s4462_s25  ;;  %v4599_v44 = vpop.f32.mrb[1].mxu0 }
 0x212   :  { %v4601_v45 = vpop.f32.mrb[2].mxu0 }
 0x213   :  { %260 = vrot.lane.b32.xlu1 %v4601_v45, %s4462_s25  ;;  %v4605_v46 = vpop.f32.mrb[3].mxu0 }
 0x281   :  { %v183_v47 = vpop.permute.xlu0 %182 }
 0x282   :  { %3983 = vmatpush3.xpose.msk.msra.mxu0 %vm184_vm2, %v183_v47 }
 0x283   :  { %3997 = vmatprep.subr.mxu0 %v4460_v21 }
 0x285   :  { %v261_v48 = vpop.permute.xlu1 %260  ;;  %3985 = vmatmul.mubr.msk.f32.vlgmr.msra.gmra.mrb[4].mxu0 %vm184_vm2, %v4595_v43 }
 0x286   :  { %3988 = vmatpush3.xpose.msk.msra.mxu1 %vm184_vm2, %v261_v48  ;;  %3998 = vmatpush3.msra.mxu0 %v4605_v46 }
 0x287   :  { %3992 = vmatprep.subr.mxu1 %v4460_v21  ;;  %3999 = vmatprep.mubr.msk.f32.mxu0 %vm4461_vm1, %v4460_v21 }
 0x288   :  { %4007 = vmatprep.subr.mxu0 %v4460_v21 }
 0x289   :  { %3990 = vmatmul.mubr.msk.f32.vlgmr.msra.gmra.mrb[0].mxu1 %vm184_vm2, %v4601_v45 }
 0x28a   :  { %3993 = vmatpush3.msra.mxu1 %v4599_v44  ;;  %3994 = vmatprep.mubr.msk.f32.mxu1 %vm4461_vm1, %v4460_v21 }
 0x28b   :  { %4002 = vmatprep.subr.mxu1 %v4460_v21 }
 0x358   :  { %v255_v49 = vpop.f32.mrb[4].mxu0 }
 0x359   :  { %v336_v50 = vmul.f32 0.25, %v255_v49  ;;  %v3986_v51 = vpop.f32.mrb[5].mxu0 }
 0x35b   :  { %v339_v52 = vsel %vm338_vm3, %v336_v50, -inf }
 0x35c   :  { %v332_v53 = vpop.f32.mrb[0].mxu1  ;;  %340 = vmax.xlane.f32.xlu1 %v339_v52 }
 0x35d   :  { %v337_v54 = vmul.f32 0.25, %v332_v53  ;;  %v3991_v55 = vpop.f32.mrb[1].mxu1 }
 0x35f   :  { %v342_v56 = vsel %vm338_vm3, %v337_v54, -inf }
 0x360   :  { %343 = vmax.xlane.f32.xlu0 %v342_v56 }
 0x36d   :  { %587 = vrot.lane.b32.xlu1 %v4601_v45, %s4463_s26 }
 0x371   :  { %507 = vrot.lane.b32.xlu1 %v4595_v43, %s4464_s27 }
 0x3e9   :  { %v341_v57 = vpop.xlane.xlu1 %340 }
 0x3ea   :  { %v345_v58 = vsub.f32 %v336_v50, %v341_v57 }
 0x3ec   :  { %v347_v59 = vmul.f32 1.442695, %v345_v58 }
 0x3ed   :  { %v344_v60 = vpop.xlane.xlu0 %343  ;;  %v588_v5 = vpop.permute.xlu1 %587 }
 0x3ee   :  { %4352 = vpow2.f32 %v347_v59  ;;  %v346_v61 = vsub.f32 %v337_v54, %v344_v60 }
 0x3f0   :  { %v349_v62 = vmul.f32 1.442695, %v346_v61 }
 0x3f1   :  { %v508_v6 = vpop.permute.xlu1 %507 }
 0x3f2   :  { %4354 = vpow2.f32 %v349_v62 }
 0x3f8   :  { %v4353_v63 = vpop.eup %4352 }
 0x3f9   :  { %v351_v2 = vsel %vm338_vm3, %v4353_v63, 0.0 }
 0x3fa   :  { %352 = vadd.xlane.f32.xlu0 %v351_v2 }
 0x3fc   :  { %v4355_v3 = vpop.eup %4354 }
 0x3fd   :  { %v354_v4 = vsel %vm338_vm3, %v4355_v3, 0.0 }
 0x3fe   :  { %355 = vadd.xlane.f32.xlu1 %v354_v4 }
 0x40f   :  { %585 = vrot.lane.b32.xlu1 %v4601_v45, %s4464_s27 }
 0x410   :  { %509 = vrot.lane.b32.xlu0 %v4595_v43, %s4463_s26 }
 0x487   :  { %v353_v7 = vpop.xlane.xlu0 %352 }
 0x488   :  { %4356 = vrcp.f32 %v353_v7 }
 0x48b   :  { %v356_v8 = vpop.xlane.xlu1 %355  ;;  %v510_v11 = vpop.permute.xlu0 %509 }
 0x48c   :  { %4358 = vrcp.f32 %v356_v8 }
 0x48f   :  { %v586_v14 = vpop.permute.xlu1 %585 }
 0x492   :  { %v4357_v9 = vpop.eup %4356 }
 0x493   :  { %v358_v10 = vmul.f32 %v4357_v9, %v4353_v63 }
 0x495   :  { %3995 = vmatmul.mubr.msk.f32.vlgmr.msra.gmra.mrb[2].mxu1 %vm338_vm3, %v358_v10 }
 0x496   :  { %v4359_v12 = vpop.eup %4358  ;;  %4003 = vmatpush3.xpose.msk.msra.mxu1 %vm184_vm2, %v510_v11  ;;  %4004 = vmatprep.mubr.msk.f32.mxu1 %vm4461_vm1, %v4460_v21 }
 0x497   :  { %v360_v13 = vmul.f32 %v4359_v12, %v4355_v3  ;;  %4012 = vmatprep.subr.mxu1 %v4460_v21 }
 0x499   :  { %4000 = vmatmul.mubr.msk.f32.vlgmr.msra.gmra.mrb[6].mxu0 %vm338_vm3, %v360_v13  ;;  %4005 = vmatmul.mubr.msk.f32.vlgmr.msra.gmra.mrb[4].mxu1 %vm184_vm2, %v508_v6 }
 0x49a   :  { %4008 = vmatpush3.xpose.msk.msra.mxu0 %vm184_vm2, %v588_v5  ;;  %4009 = vmatprep.mubr.msk.f32.mxu0 %vm4461_vm1, %v4460_v21 }
 0x49b   :  { %4017 = vmatprep.subr.mxu0 %v4460_v21  ;;  %4014 = vmatprep.mubr.msk.f32.mxu1 %vm4461_vm1, %v4460_v21 }
 0x49d   :  { %4010 = vmatmul.mubr.msk.f32.vlgmr.msra.gmra.mrb[8].mxu0 %vm184_vm2, %v586_v14 }
 0x49e   :  { %4019 = vmatprep.mubr.msk.f32.mxu0 %vm4461_vm1, %v4460_v21 }
 0x568   :  { %v4651_v15 = vpop.f32.mrb[2].mxu1 }
 0x569   :  { %v3996_v16 = vpop.f32.mrb[3].mxu1 }
 0x56c   :  { %v4653_v17 = vpop.f32.mrb[6].mxu0  ;;  %v581_v18 = vpop.f32.mrb[4].mxu1 }
 0x56d   :  { %v663_v19 = vmul.f32 0.25, %v581_v18  ;;  %v4001_v20 = vpop.f32.mrb[7].mxu0  ;;  %v4006_v22 = vpop.f32.mrb[5].mxu1 }
 0x56f   :  { %v665_v23 = vsel %vm338_vm3, %v663_v19, -inf }
 0x570   :  { %v659_v24 = vpop.f32.mrb[8].mxu0  ;;  %666 = vmax.xlane.f32.xlu0 %v665_v23 }
 0x571   :  { %v664_v25 = vmul.f32 0.25, %v659_v24  ;;  %v4011_v26 = vpop.f32.mrb[9].mxu0 }
 0x573   :  { %v668_v27 = vsel %vm338_vm3, %v664_v25, -inf }
 0x574   :  { %669 = vmax.xlane.f32.xlu1 %v668_v27 }
 0x585   :  { %765 = vrot.lane.b32.xlu1 %v4605_v46, %s4464_s27 }
 0x586   :  { %688 = vrot.lane.b32.xlu0 %v4599_v44, %s4464_s27 }
 0x589   :  { %843 = vrot.lane.b32.xlu1 %v4595_v43, %s4465_s28 }
 0x58d   :  { %921 = vrot.lane.b32.xlu1 %v4601_v45, %s4465_s28 }
 0x591   :  { %919 = vrot.lane.b32.xlu1 %v4601_v45, %s4466_s29 }
 0x5fd   :  { %v667_v28 = vpop.xlane.xlu0 %666 }
 0x5fe   :  { %v671_v29 = vsub.f32 %v663_v19, %v667_v28 }
 0x600   :  { %v673_v30 = vmul.f32 1.442695, %v671_v29 }
 0x601   :  { %v670_v31 = vpop.xlane.xlu1 %669  ;;  %v689_v32 = vpop.permute.xlu0 %688 }
 0x602   :  { %4360 = vpow2.f32 %v673_v30  ;;  %v672_v33 = vsub.f32 %v664_v25, %v670_v31  ;;  %4013 = vmatpush3.msra.mxu1 %v689_v32 }
 0x603   :  { %4022 = vmatprep.subr.mxu1 %v4460_v21 }
 0x604   :  { %v675_v34 = vmul.f32 1.442695, %v672_v33 }
 0x605   :  { %v766_v35 = vpop.permute.xlu1 %765 }
 0x606   :  { %4362 = vpow2.f32 %v675_v34  ;;  %4018 = vmatpush3.msra.mxu0 %v766_v35 }
 0x607   :  { %4027 = vmatprep.subr.mxu0 %v4460_v21 }
 0x609   :  { %v844_v42 = vpop.permute.xlu1 %843 }
 0x60c   :  { %v4361_v36 = vpop.eup %4360 }
 0x60d   :  { %v677_v37 = vsel %vm338_vm3, %v4361_v36, 0.0  ;;  %v922_v50 = vpop.permute.xlu1 %921 }
 0x60e   :  { %678 = vadd.xlane.f32.xlu0 %v677_v37 }
 0x610   :  { %v4363_v38 = vpop.eup %4362 }
 0x611   :  { %v680_v39 = vsel %vm338_vm3, %v4363_v38, 0.0  ;;  %v920_v53 = vpop.permute.xlu1 %919 }
 0x612   :  { %681 = vadd.xlane.f32.xlu0 %v680_v39 }
 0x628   :  { %841 = vrot.lane.b32.xlu0 %v4595_v43, %s4466_s29 }
 0x69b   :  { %v679_v40 = vpop.xlane.xlu0 %678 }
 0x69c   :  { %4364 = vrcp.f32 %v679_v40 }
 0x69f   :  { %v682_v41 = vpop.xlane.xlu0 %681 }
 0x6a0   :  { %4366 = vrcp.f32 %v682_v41 }
 0x6a3   :  { %v842_v52 = vpop.permute.xlu0 %841 }
 0x6a6   :  { %v4365_v47 = vpop.eup %4364 }
 0x6a7   :  { %v684_v48 = vmul.f32 %v4365_v47, %v4361_v36 }
 0x6a9   :  { %4015 = vmatmul.mubr.msk.f32.vlgmr.msra.gmra.mrb[6].mxu1 %vm338_vm3, %v684_v48 }
 0x6aa   :  { %v4367_v49 = vpop.eup %4366  ;;  %4023 = vmatpush3.xpose.msk.msra.mxu1 %vm184_vm2, %v844_v42  ;;  %4024 = vmatprep.mubr.msk.f32.mxu1 %vm4461_vm1, %v4460_v21 }
 0x6ab   :  { %v686_v51 = vmul.f32 %v4367_v49, %v4363_v38  ;;  %4032 = vmatprep.subr.mxu1 %v4460_v21 }
 0x6ad   :  { %4020 = vmatmul.mubr.msk.f32.vlgmr.msra.gmra.mrb[10].mxu0 %vm338_vm3, %v686_v51  ;;  %4025 = vmatmul.mubr.msk.f32.vlgmr.msra.gmra.mrb[8].mxu1 %vm184_vm2, %v842_v52 }
 0x6ae   :  { %4028 = vmatpush3.xpose.msk.msra.mxu0 %vm184_vm2, %v922_v50  ;;  %4029 = vmatprep.mubr.msk.f32.mxu0 %vm4461_vm1, %v4460_v21 }
 0x6af   :  { %4037 = vmatprep.subr.mxu0 %v4460_v21  ;;  %4034 = vmatprep.mubr.msk.f32.mxu1 %vm4461_vm1, %v4460_v21 }
 0x6b1   :  { %4030 = vmatmul.mubr.msk.f32.vlgmr.msra.gmra.mrb[12].mxu0 %vm184_vm2, %v920_v53 }
 0x6b2   :  { %4039 = vmatprep.mubr.msk.f32.mxu0 %vm4461_vm1, %v4460_v21 }
 0x77c   :  { %v4689_v54 = vpop.f32.mrb[6].mxu1 }
 0x77d   :  { %v4016_v55 = vpop.f32.mrb[7].mxu1 }
 0x780   :  { %v4691_v56 = vpop.f32.mrb[10].mxu0  ;;  %v915_v57 = vpop.f32.mrb[8].mxu1 }
 0x781   :  { %v997_v58 = vmul.f32 0.25, %v915_v57  ;;  %v4021_v59 = vpop.f32.mrb[11].mxu0  ;;  %v4026_v60 = vpop.f32.mrb[9].mxu1 }
 0x782   :  { %v1537_v60 = vld [vmem:[%s5175_s4 + $0x8] sm:$0xff] }
 0x783   :  { %v999_v61 = vsel %vm338_vm3, %v997_v58, -inf }
 0x784   :  { %v993_v62 = vpop.f32.mrb[12].mxu0  ;;  %1000 = vmax.xlane.f32.xlu0 %v999_v61  ;;  %v1538_v61 = vld [vmem:[%s5175_s4 + $0x10] sm:$0xff] }
 0x785   :  { %v998_v63 = vmul.f32 0.25, %v993_v62  ;;  %v4031_v2 = vpop.f32.mrb[13].mxu0 }
 0x787   :  { %v1002_v3 = vsel %vm338_vm3, %v998_v63, -inf }
 0x788   :  { %1003 = vmax.xlane.f32.xlu1 %v1002_v3  ;;  %v1540_v3 = vld [vmem:[%s5175_s4 + $0x20] sm:$0xff] }
 0x799   :  { %1097 = vrot.lane.b32.xlu1 %v4605_v46, %s4466_s29 }
 0x79a   :  { %1021 = vrot.lane.b32.xlu0 %v4599_v44, %s4466_s29 }
 0x79d   :  { %1175 = vrot.lane.b32.xlu1 %v4595_v43, %s4467_s30 }
 0x7a1   :  { %1253 = vrot.lane.b32.xlu1 %v4601_v45, %s4467_s30 }
 0x7a5   :  { %1251 = vrot.lane.b32.xlu1 %v4601_v45, %s4468_s13 }
 0x811   :  { %v1001_v4 = vpop.xlane.xlu0 %1000 }
 0x812   :  { %v1005_v5 = vsub.f32 %v997_v58, %v1001_v4  ;;  %v1541_v4 = vld [vmem:[%s5175_s4 + $0x28] sm:$0xff] }
 0x814   :  { %v1007_v6 = vmul.f32 1.442695, %v1005_v5  ;;  %v4256_v5 = vpack.c.bf16 %v1541_v4, %v1540_v3  ;;  %v1789_v3 = vld [vmem:[%s5181_s10] sm:$0xff]  ;;  %v1790_v4 = vld [vmem:[%s5181_s10 + $0x8] sm:$0xff] }
 0x815   :  { %v1004_v7 = vpop.xlane.xlu1 %1003  ;;  %v1022_v8 = vpop.permute.xlu0 %1021 }
 0x816   :  { %4368 = vpow2.f32 %v1007_v6  ;;  %v1006_v9 = vsub.f32 %v998_v63, %v1004_v7  ;;  %4033 = vmatpush3.msra.mxu1 %v1022_v8  ;;  %v1539_v63 = vld [vmem:[%s5175_s4 + $0x18] sm:$0xff]  ;;  %v1542_v6 = vld [vmem:[%s5175_s4 + $0x30] sm:$0xff] }
 0x817   :  { %4042 = vmatprep.subr.mxu1 %v4460_v21  ;;  %v4252_v2 = vpack.c.bf16 %v1539_v63, %v1538_v61  ;;  %v1543_v7 = vld [vmem:[%s5175_s4 + $0x38] sm:$0xff] }
 0x818   :  { %v1009_v10 = vmul.f32 1.442695, %v1006_v9  ;;  %v4260_v8 = vpack.c.bf16 %v1543_v7, %v1542_v6  ;;  %v1791_v6 = vld [vmem:[%s5181_s10 + $0x10] sm:$0xff]  ;;  %v1792_v7 = vld [vmem:[%s5181_s10 + $0x18] sm:$0xff] }
 0x819   :  { %v1098_v11 = vpop.permute.xlu1 %1097 }
 0x81a   :  { %4370 = vpow2.f32 %v1009_v10  ;;  %4038 = vmatpush3.msra.mxu0 %v1098_v11 }
 0x81b   :  { %4047 = vmatprep.subr.mxu0 %v4460_v21 }
 0x81d   :  { %v1176_v19 = vpop.permute.xlu1 %1175 }
 0x820   :  { %v4369_v12 = vpop.eup %4368 }
 0x821   :  { %v1011_v13 = vsel %vm338_vm3, %v4369_v12, 0.0  ;;  %v1254_v24 = vpop.permute.xlu1 %1253 }
 0x822   :  { %1012 = vadd.xlane.f32.xlu0 %v1011_v13 }
 0x824   :  { %v4371_v45 = vpop.eup %4370 }
 0x825   :  { %v1014_v14 = vsel %vm338_vm3, %v4371_v45, 0.0  ;;  %v1252_v26 = vpop.permute.xlu1 %1251 }
 0x826   :  { %1015 = vadd.xlane.f32.xlu0 %v1014_v14 }
 0x83c   :  { %1173 = vrot.lane.b32.xlu0 %v4595_v43, %s4468_s13 }
 0x8af   :  { %v1013_v16 = vpop.xlane.xlu0 %1012 }
 0x8b0   :  { %4372 = vrcp.f32 %v1013_v16 }
 0x8b3   :  { %v1016_v18 = vpop.xlane.xlu0 %1015 }
 0x8b4   :  { %4374 = vrcp.f32 %v1016_v18 }
 0x8b7   :  { %v1174_v43 = vpop.permute.xlu0 %1173 }
 0x8ba   :  { %v4373_v20 = vpop.eup %4372 }
 0x8bb   :  { %v1018_v22 = vmul.f32 %v4373_v20, %v4369_v12 }
 0x8bd   :  { %4035 = vmatmul.mubr.msk.f32.vlgmr.msra.gmra.mrb[10].mxu1 %vm338_vm3, %v1018_v22 }
 0x8be   :  { %v4375_v23 = vpop.eup %4374  ;;  %4043 = vmatpush3.xpose.msk.msra.mxu1 %vm184_vm2, %v1176_v19  ;;  %4044 = vmatprep.mubr.msk.f32.mxu1 %vm4461_vm1, %v4460_v21 }
 0x8bf   :  { %v1020_v25 = vmul.f32 %v4375_v23, %v4371_v45  ;;  %4052 = vmatprep.subr.mxu1 %v4460_v21 }
 0x8c1   :  { %4040 = vmatmul.mubr.msk.f32.vlgmr.msra.gmra.mrb[14].mxu0 %vm338_vm3, %v1020_v25  ;;  %4045 = vmatmul.mubr.msk.f32.vlgmr.msra.gmra.mrb[12].mxu1 %vm184_vm2, %v1174_v43 }
 0x8c2   :  { %4048 = vmatpush3.xpose.msk.msra.mxu0 %vm184_vm2, %v1254_v24  ;;  %4049 = vmatprep.mubr.msk.f32.mxu0 %vm4461_vm1, %v4460_v21 }
 0x8c3   :  { %4057 = vmatprep.subr.mxu0 %v4460_v21  ;;  %4054 = vmatprep.mubr.msk.f32.mxu1 %vm4461_vm1, %v4460_v21 }
 0x8c5   :  { %4050 = vmatmul.mubr.msk.f32.vlgmr.msra.gmra.mrb[16].mxu0 %vm184_vm2, %v1252_v26 }
 0x8c6   :  { %4059 = vmatprep.mubr.msk.f32.mxu0 %vm4461_vm1, %v4460_v21 }
 0x990   :  { %v1093_v27 = vpop.f32.mrb[10].mxu1 }
 0x991   :  { %v4036_v28 = vpop.f32.mrb[11].mxu1 }
 0x994   :  { %v1169_v29 = vpop.f32.mrb[14].mxu0  ;;  %v1247_v30 = vpop.f32.mrb[12].mxu1 }
 0x995   :  { %v1329_v31 = vmul.f32 0.25, %v1247_v30  ;;  %v4041_v32 = vpop.f32.mrb[15].mxu0  ;;  %v4046_v33 = vpop.f32.mrb[13].mxu1 }
 0x997   :  { %v1331_v34 = vsel %vm338_vm3, %v1329_v31, -inf }
 0x998   :  { %v1325_v35 = vpop.f32.mrb[16].mxu0  ;;  %1332 = vmax.xlane.f32.xlu0 %v1331_v34 }
 0x999   :  { %v1330_v36 = vmul.f32 0.25, %v1325_v35  ;;  %v4051_v37 = vpop.f32.mrb[17].mxu0 }
 0x99b   :  { %v1334_v38 = vsel %vm338_vm3, %v1330_v36, -inf }
 0x99c   :  { %1335 = vmax.xlane.f32.xlu1 %v1334_v38 }
 0x9ad   :  { %1429 = vrot.lane.b32.xlu1 %v4605_v46, %s4468_s13 }
 0x9b1   :  { %1507 = vrot.lane.b32.xlu1 %v4689_v54, %s4467_s30 }
 0x9b5   :  { %1509 = vrot.lane.b32.xlu1 %v4691_v56, %s4467_s30 }
 0x9b9   :  { %1517 = vrot.lane.b32.xlu1 %v1169_v29, %s4465_s28 }
 0xa25   :  { %v1333_v39 = vpop.xlane.xlu0 %1332 }
 0xa26   :  { %v1337_v40 = vsub.f32 %v1329_v31, %v1333_v39 }
 0xa28   :  { %v1339_v41 = vmul.f32 1.442695, %v1337_v40 }
 0xa29   :  { %v1336_v42 = vpop.xlane.xlu1 %1335 }
 0xa2a   :  { %4376 = vpow2.f32 %v1339_v41  ;;  %v1338_v47 = vsub.f32 %v1330_v36, %v1336_v42  ;;  %v1679_v41 = vld [vmem:[%s5179_s8] sm:$0xff]  ;;  %v1680_v42 = vld [vmem:[%s5179_s8 + $0x8] sm:$0xff] }
 0xa2c   :  { %v1341_v48 = vmul.f32 1.442695, %v1338_v47  ;;  %v4264_v47 = vpack.c.bf16 %v1680_v42, %v1679_v41 }
 0xa2d   :  { %v1430_v49 = vpop.permute.xlu1 %1429 }
 0xa2e   :  { %4378 = vpow2.f32 %v1341_v48  ;;  %4058 = vmatpush3.msra.mxu0 %v1430_v49  ;;  %v1681_v48 = vld [vmem:[%s5179_s8 + $0x10] sm:$0xff]  ;;  %v1682_v49 = vld [vmem:[%s5179_s8 + $0x18] sm:$0xff] }
 0xa2f   :  { %4265 = vmatprep.subr.bf16.mxu0 %v4264_v47 }
 0xa31   :  { %v1508_v13 = vpop.permute.xlu1 %1507 }
 0xa32   :  { %v1529_v16 = vsel %vm184_vm2, %v4651_v15, %v1508_v13  ;;  %v3781_v15 = vld [vmem:[%s5176_s5] ss:$0 sm:$0xff]  ;;  %v1796_v13 = vld [vmem:[%s5181_s10 + $0x38] sm:$0xff] }
 0xa34   :  { %v4377_v50 = vpop.eup %4376 }
 0xa35   :  { %v1343_v46 = vsel %vm338_vm3, %v4377_v50, 0.0  ;;  %v1510_v45 = vpop.permute.xlu1 %1509 }
 0xa36   :  { %1344 = vadd.xlane.f32.xlu0 %v1343_v46  ;;  %v1530_v23 = vsel %vm184_vm2, %v4653_v17, %v1510_v45 }
 0xa38   :  { %v4379_v51 = vpop.eup %4378 }
 0xa39   :  { %v1346_v52 = vsel %vm338_vm3, %v4379_v51, 0.0  ;;  %v1518_v18 = vpop.permute.xlu1 %1517 }
 0xa3a   :  { %1347 = vadd.xlane.f32.xlu0 %v1346_v52  ;;  %v1532_v24 = vsel %vm46_vm0, %v1530_v23, %v1518_v18 }
 0xa50   :  { %1353 = vrot.lane.b32.xlu0 %v4599_v44, %s4468_s13  ;;  %v1536_v44 = vld [vmem:[%s5175_s4] sm:$0xff] }
 0xa51   :  { %v4248_v62 = vpack.c.bf16 %v1537_v60, %v1536_v44 }
 0xa54   :  { %1515 = vrot.lane.b32.xlu0 %v1093_v27, %s4465_s28 }
 0xac3   :  { %v1345_v53 = vpop.xlane.xlu0 %1344 }
 0xac4   :  { %4380 = vrcp.f32 %v1345_v53 }
 0xac7   :  { %v1348_v54 = vpop.xlane.xlu0 %1347 }
 0xac8   :  { %4382 = vrcp.f32 %v1348_v54 }
 0xacb   :  { %v1354_v55 = vpop.permute.xlu0 %1353 }
 0xacc   :  { %4053 = vmatpush3.msra.mxu1 %v1354_v55 }
 0xacd   :  { %4249 = vmatprep.subr.bf16.mxu1 %v4248_v62 }
 0xace   :  { %v4381_v56 = vpop.eup %4380 }
 0xacf   :  { %v1350_v57 = vmul.f32 %v4381_v56, %v4377_v50  ;;  %v1516_v14 = vpop.permute.xlu0 %1515  ;;  %v4268_v50 = vpack.c.bf16 %v1682_v49, %v1681_v48 }
 0xad0   :  { %v1531_v19 = vsel %vm46_vm0, %v1529_v16, %v1516_v14  ;;  %v3786_v14 = vld [vmem:[%s5180_s9] ss:$0 sm:$0xff] }
 0xad1   :  { %4055 = vmatmul.mubr.msk.f32.vlgmr.msra.gmra.mrb[14].mxu1 %vm338_vm3, %v1350_v57  ;;  %v3784_v57 = vld [vmem:[%s5177_s6] ss:$0 sm:$0xff] }
 0xad2   :  { %v4383_v58 = vpop.eup %4382  ;;  %4251 = vmatpush3.bf16.msra.mxu1 %v4248_v62 }
 0xad3   :  { %v1352_v59 = vmul.f32 %v4383_v58, %v4379_v51  ;;  %4253 = vmatprep.subr.bf16.mxu1 %v4252_v2 }
 0xad5   :  { %4060 = vmatmul.mubr.msk.f32.vlgmr.msra.gmra.mrb[18].mxu0 %vm338_vm3, %v1352_v59  ;;  %v3785_v59 = vld [vmem:[%s5178_s7] ss:$0 sm:$0xff] }
 0xad6   :  { %4255 = vmatpush3.bf16.msra.mxu1 %v4252_v2  ;;  %4267 = vmatpush3.bf16.msra.mxu0 %v4264_v47 }
 0xad7   :  { %4257 = vmatprep.subr.bf16.mxu1 %v4256_v5  ;;  %4269 = vmatprep.subr.bf16.mxu0 %v4268_v50 }
 0xada   :  { %4259 = vmatpush3.bf16.msra.mxu1 %v4256_v5  ;;  %4271 = vmatpush3.bf16.msra.mxu0 %v4268_v50  ;;  %v4272_v5 = vpack.c.bf16 %v1790_v4, %v1789_v3  ;;  %v3802_v4 = vld [vmem:[%s5174_s3 + $0x70] sm:$0xff] }
 0xadb   :  { %4261 = vmatprep.subr.bf16.mxu1 %v4260_v8 }
 0xadc   :  { %4273 = vmatprep.subr.bf16.mxu0 %v4272_v5 }
 0xade   :  { %4263 = vmatpush3.bf16.msra.mxu1 %v4260_v8  ;;  %v4276_v8 = vpack.c.bf16 %v1792_v7, %v1791_v6 }
 0xba4   :  { %v1425_v9 = vpop.f32.mrb[14].mxu1 }
 0xba5   :  { %1523 = vrot.lane.b32.xlu0 %v1425_v9, %s4463_s26  ;;  %v4056_v10 = vpop.f32.mrb[15].mxu1  ;;  %v1793_v9 = vld [vmem:[%s5181_s10 + $0x20] sm:$0xff] }
 0xba6   :  { %v1794_v10 = vld [vmem:[%s5181_s10 + $0x28] sm:$0xff] }
 0xba8   :  { %v1501_v11 = vpop.f32.mrb[18].mxu0 }
 0xba9   :  { %1525 = vrot.lane.b32.xlu1 %v1501_v11, %s4463_s26  ;;  %v4061_v12 = vpop.f32.mrb[19].mxu0  ;;  %v4280_v11 = vpack.c.bf16 %v1794_v10, %v1793_v9 }
 0xbaa   :  { %v1795_v12 = vld [vmem:[%s5181_s10 + $0x30] sm:$0xff] }
 0xbab   :  { %v4284_v45 = vpack.c.bf16 %v1796_v13, %v1795_v12 }
 0xc17   :  { %v1524_v20 = vpop.permute.xlu0 %1523 }
 0xc18   :  { %v1534_v22 = vsel %vm1533_vm4, %v1531_v19, %v1524_v20 }
 0xc19   :  { %4078 = vmatprep.mubr.msk.f32.mxu1 %vm1551_vm5, %v1534_v22 }
 0xc1b   :  { %v1526_v25 = vpop.permute.xlu1 %1525 }
 0xc1c   :  { %v1535_v43 = vsel %vm1533_vm4, %v1532_v24, %v1526_v25 }
 0xc1d   :  { %4079 = vmatmul.mubr.msk.f32.vlgmr.msra.gmra.mrb[16].mxu1 %vm1551_vm5, %v1535_v43 }
 0xc1e   :  { %2012 = vmatprep.mubr.f32.mxu1 %v4460_v21 }
 0xcf0   :  { %v4080_v26 = vpop.f32.mrb[16].mxu1 }
 0xcf1   :  { %v1630_v27 = vadd.f32 %v4080_v26, %v3781_v15  ;;  %v1624_v28 = vpop.f32.mrb[17].mxu1 }
 0xcf2   :  { %v1625_v29 = vadd.f32 %v3781_v15, %v1624_v28 }
 0xcf3   :  { %v4784_v30 = vadd.f32 %v1630_v27, %v4545_v1 }
 0xcf4   :  { %v4787_v17 = vadd.f32 %v1625_v29, %v4540_v0 }
 0xcf5   :  { %v1640_v31 = vsel %vm46_vm0, %v4784_v30, 0.0 }
 0xcf6   :  { %1641 = vadd.xlane.f32.xlu1 %v1640_v31  ;;  %v1637_v32 = vsel %vm46_vm0, %v4787_v17, 0.0 }
 0xcf7   :  { %1638 = vadd.xlane.f32.xlu0 %v1637_v32 }
 0xd83   :  { %v1642_v33 = vpop.xlane.xlu1 %1641 }
 0xd84   :  { %v1644_v34 = vmul.f32 0.03125, %v1642_v33  ;;  %v1639_v35 = vpop.xlane.xlu0 %1638 }
 0xd85   :  { %v1643_v36 = vmul.f32 0.03125, %v1639_v35 }
 0xd86   :  { %v1646_v37 = vsub.f32 %v4784_v30, %v1644_v34 }
 0xd87   :  { %v1645_v1 = vsub.f32 %v4787_v17, %v1643_v36 }
 0xd88   :  { %v1648_v39 = vmul.f32 %v1646_v37, %v1646_v37 }
 0xd89   :  { %v1647_v38 = vmul.f32 %v1645_v1, %v1645_v1 }
 0xd8a   :  { %v1652_v40 = vsel %vm46_vm0, %v1648_v39, 0.0 }
 0xd8b   :  { %v1649_v0 = vsel %vm46_vm0, %v1647_v38, 0.0  ;;  %v3789_v38 = vld [vmem:[%s5182_s11] ss:$0 sm:$0xff] }
 0xd8c   :  { %1650 = vadd.xlane.f32.xlu0 %v1649_v0 }
 0xd90   :  { %1653 = vadd.xlane.f32.xlu0 %v1652_v40 }
 0xe19   :  { %v1651_v46 = vpop.xlane.xlu0 %1650 }
 0xe1a   :  { %v1655_v51 = vmul.f32 0.03125, %v1651_v46 }
 0xe1c   :  { %v1657_v52 = vadd.f32 1e-05, %v1655_v51 }
 0xe1d   :  { %v1654_v53 = vpop.xlane.xlu0 %1653 }
 0xe1e   :  { %4384 = vrsqrt.f32 %v1657_v52  ;;  %v1656_v54 = vmul.f32 0.03125, %v1654_v53 }
 0xe20   :  { %v1658_v55 = vadd.f32 1e-05, %v1656_v54 }
 0xe22   :  { %4386 = vrsqrt.f32 %v1658_v55 }
 0xe28   :  { %v4385_v56 = vpop.eup %4384 }
 0xe29   :  { %v1661_v58 = vmul.f32 %v4385_v56, %v1645_v1 }
 0xe2b   :  { %v1669_v44 = vmul.f32 %v3784_v57, %v1661_v58  ;;  %v3799_v58 = vld [vmem:[%s5174_s3 + $0x58] sm:$0xff] }
 0xe2c   :  { %v4387_v60 = vpop.eup %4386 }
 0xe2d   :  { %v1662_v61 = vmul.f32 %v4387_v60, %v1646_v37  ;;  %v1677_v62 = vadd.f32 %v3785_v59, %v1669_v44  ;;  %v3796_v44 = vld [vmem:[%s5174_s3 + $0x40] sm:$0xff]  ;;  %v3798_v60 = vld [vmem:[%s5174_s3 + $0x50] sm:$0xff] }
 0xe2f   :  { %v1670_v63 = vmul.f32 %v3784_v57, %v1662_v61  ;;  %4089 = vmatprep.mubr.msk.f32.mxu0 %vm46_vm0, %v1677_v62  ;;  %v3797_v57 = vld [vmem:[%s5174_s3 + $0x48] sm:$0xff]  ;;  %v4290_v61 = vpack.c.bf16 %v3798_v60, %v3796_v44 }
 0xe30   :  { %v3801_v62 = vld [vmem:[%s5174_s3 + $0x68] sm:$0xff] }
 0xe31   :  { %v1678_v2 = vadd.f32 %v3785_v59, %v1670_v63  ;;  %v4288_v59 = vpack.c.bf16 %v3799_v58, %v3797_v57  ;;  %v3803_v63 = vld [vmem:[%s5174_s3 + $0x78] sm:$0xff] }
 0xe32   :  { %v4292_v3 = vpack.c.bf16 %v3803_v63, %v3801_v62 }
 0xe33   :  { %4090 = vmatmul.mubr.msk.f32.vlgmr.msra.gmra.mrb[20].mxu0 %vm46_vm0, %v1678_v2  ;;  %4289 = vmatprep.subr.bf16.mxu1 %v4288_v59  ;;  %v3800_v2 = vld [vmem:[%s5174_s3 + $0x60] sm:$0xff]  ;;  %s3742_s3 = sshll.u32 %s4469_s21, 4  ;;  %s3743_s3 = int_to_ptr.vmem [resolvable:$true] %s3742_s3 }
 0xe34   :  { %4275 = vmatpush3.bf16.msra.mxu0 %v4272_v5  ;;  %4291 = vmatpush1.bf16.msra.mxu1 %v4290_v61  ;;  %v4294_v5 = vpack.c.bf16 %v3802_v4, %v3800_v2  ;;  %s4436_s22 = scalar_lea.vmem %s3743_s3, 256  ;;  %p4441_p1 = scmp.lt.s32.totalorder %s3743_s3, %s3743_s3 }
 0xe35   :  { %4277 = vmatprep.subr.bf16.mxu0 %v4276_v8  ;;  %4293 = vmatprep.subr.bf16.mxu1 %v4292_v3  ;;  %p4437_p0 = scmp.ne.s32.totalorder %s3743_s3, %s4436_s22  ;;  %p4442_p2 = scmp.lt.s32.totalorder %s4436_s22, %s4436_s22 }
 0xe37   :  { %p4443_p3 = por %p4442_p2, %p4441_p1 }
 0xe38   :  { %4279 = vmatpush3.bf16.msra.mxu0 %v4276_v8  ;;  %4295 = vmatpush1.bf16.msra.mxu1 %v4294_v5 }
 0xe39   :  { %4281 = vmatprep.subr.bf16.mxu0 %v4280_v11  ;;  %4116 = vmatprep.subr.mxu1 %v4460_v21  ;;  %p4444_p4 = pnand %p4443_p3, %p4437_p0 }
 0xe3c   :  { %4283 = vmatpush3.bf16.msra.mxu0 %v4280_v11 }
 0xe3d   :  { %4285 = vmatprep.subr.bf16.mxu0 %v4284_v45 }
 0xe40   :  { %4287 = vmatpush3.bf16.msra.mxu0 %v4284_v45  ;;  %v3794_v45 = vld [vmem:[%s5172_s1 + $0x1] ss:$0 sm:$0xff] }
 0xe41   :  { %4111 = vmatprep.subr.mxu0 %v4460_v21 }
 0xf06   :  { %v4091_v16 = vpop.f32.mrb[20].mxu0 }
 0xf07   :  { %v1768_v18 = vadd.f32 %v4091_v16, %v3786_v14  ;;  %v1762_v19 = vpop.f32.mrb[21].mxu0 }
 0xf08   :  { %v1763_v20 = vadd.f32 %v3786_v14, %v1762_v19 }
 0xf09   :  { %v1774_v22 = vmul.f32 0.044715, %v1768_v18  ;;  %v1772_v36 = vmul.f32 0.5, %v1768_v18 }
 0xf0a   :  { %v1773_v23 = vmul.f32 0.044715, %v1763_v20  ;;  %v1771_v34 = vmul.f32 0.5, %v1763_v20 }
 0xf0b   :  { %v1776_v24 = vmul.f32 %v1774_v22, %v1768_v18 }
 0xf0c   :  { %v1775_v25 = vmul.f32 %v1773_v23, %v1763_v20 }
 0xf0d   :  { %v1778_v43 = vmul.f32 %v1776_v24, %v1768_v18 }
 0xf0e   :  { %v1777_v15 = vmul.f32 %v1775_v25, %v1763_v20 }
 0xf0f   :  { %v1780_v26 = vadd.f32 %v1778_v43, %v1768_v18  ;;  %v3795_v18 = vld [vmem:[%s5173_s2 + $0x1] ss:$0 sm:$0xff] }
 0xf10   :  { %v1779_v27 = vadd.f32 %v1777_v15, %v1763_v20 }
 0xf11   :  { %v1782_v28 = vmul.f32 0.7978846, %v1780_v26 }
 0xf12   :  { %v1781_v29 = vmul.f32 0.7978846, %v1779_v27 }
 0xf13   :  { %4388 = vtanh.f32 %v1782_v28 }
 0xf14   :  { %4390 = vtanh.f32 %v1781_v29 }
 0xf1d   :  { %v4389_v31 = vpop.eup %4388 }
 0xf1e   :  { %v4391_v32 = vpop.eup %4390  ;;  %v1786_v33 = vadd.f32 1.0, %v4389_v31 }
 0xf1f   :  { %v1785_v35 = vadd.f32 1.0, %v4391_v32 }
 0xf20   :  { %v1788_v1 = vmul.f32 %v1786_v33, %v1772_v36 }
 0xf21   :  { %v1787_v37 = vmul.f32 %v1785_v35, %v1771_v34 }
 0xf23   :  { %4108 = vmatprep.mubr.msk.f32.mxu0 %vm1551_vm5, %v1787_v37 }
 0xf24   :  { %4109 = vmatmul.mubr.msk.f32.vlgmr.msra.gmra.mrb[22].mxu0 %vm1551_vm5, %v1788_v1 }
 0xf25   :  { %4113 = vmatprep.mubr.msk.f32.mxu0 %vm4461_vm1, %v4460_v21 }
 0xff7   :  { %v4110_v0 = vpop.f32.mrb[22].mxu0 }
 0xff8   :  { %v1882_v39 = vadd.f32 %v4110_v0, %v3789_v38  ;;  %v1876_v40 = vpop.f32.mrb[23].mxu0 }
 0xff9   :  { %v1877_v41 = vadd.f32 %v3789_v38, %v1876_v40 }
 0xffa   :  { %v4853_v42 = vadd.f32 %v1882_v39, %v4784_v30 }
 0xffb   :  { %v4856_v47 = vadd.f32 %v1877_v41, %v4787_v17 }
 0xffc   :  { %v1894_v48 = vsel %vm46_vm0, %v4853_v42, 0.0 }
 0xffd   :  { %1895 = vadd.xlane.f32.xlu1 %v1894_v48  ;;  %v1891_v49 = vsel %vm46_vm0, %v4856_v47, 0.0 }
 0xffe   :  { %1892 = vadd.xlane.f32.xlu0 %v1891_v49 }
0x108a   :  { %v1896_v50 = vpop.xlane.xlu1 %1895 }
0x108b   :  { %v1898_v46 = vmul.f32 0.03125, %v1896_v50  ;;  %v1893_v51 = vpop.xlane.xlu0 %1892 }
0x108c   :  { %v1897_v52 = vmul.f32 0.03125, %v1893_v51 }
0x108d   :  { %v1900_v53 = vsub.f32 %v4853_v42, %v1898_v46 }
0x108e   :  { %v1899_v30 = vsub.f32 %v4856_v47, %v1897_v52 }
0x108f   :  { %v1902_v54 = vmul.f32 %v1900_v53, %v1900_v53 }
0x1090   :  { %v1901_v55 = vmul.f32 %v1899_v30, %v1899_v30 }
0x1091   :  { %v1906_v17 = vsel %vm46_vm0, %v1902_v54, 0.0 }
0x1092   :  { %1907 = vadd.xlane.f32.xlu1 %v1906_v17  ;;  %v1903_v56 = vsel %vm46_vm0, %v1901_v55, 0.0 }
0x1093   :  { %1904 = vadd.xlane.f32.xlu0 %v1903_v56 }
0x111f   :  { %v1908_v6 = vpop.xlane.xlu1 %1907 }
0x1120   :  { %v1910_v7 = vmul.f32 0.03125, %v1908_v6  ;;  %v1905_v8 = vpop.xlane.xlu0 %1904 }
0x1121   :  { %v1909_v9 = vmul.f32 0.03125, %v1905_v8 }
0x1122   :  { %v1912_v10 = vadd.f32 1e-05, %v1910_v7 }
0x1123   :  { %v1911_v11 = vadd.f32 1e-05, %v1909_v9 }
0x1124   :  { %4392 = vrsqrt.f32 %v1912_v10 }
0x1125   :  { %4394 = vrsqrt.f32 %v1911_v11 }
0x112e   :  { %v4393_v12 = vpop.eup %4392 }
0x112f   :  { %v4395_v13 = vpop.eup %4394  ;;  %v1916_v16 = vmul.f32 %v4393_v12, %v1900_v53 }
0x1130   :  { %v1915_v14 = vmul.f32 %v4395_v13, %v1899_v30 }
0x1131   :  { %v1924_v22 = vmul.f32 %v3794_v45, %v1916_v16 }
0x1132   :  { %v1923_v19 = vmul.f32 %v3794_v45, %v1915_v14 }
0x1133   :  { %v1932_v23 = vadd.f32 %v3795_v18, %v1924_v22 }
0x1134   :  { %v1931_v20 = vadd.f32 %v3795_v18, %v1923_v19 }
0x1136   :  { %3804 = vmatmul.mubr.msk.f32.vlgmr.msra.gmra.mrb[18].mxu1 %vm46_vm0, %v1931_v20 }
0x1137   :  { %2018 = vmatprep.mubr.f32.mxu1 %v4460_v21 }
0x113a   :  { %3805 = vmatmul.mubr.msk.f32.gmra.mrb[20].mxu1 %vm46_vm0, %v1932_v23 }
0x113b   :  { %4118 = vmatprep.mubr.msk.f32.mxu1 %vm4461_vm1, %v4460_v21 }
0x1209   :  { %v4902_v24 = vpop.f32.mrb[18].mxu1 }
0x120a   :  { %2026 = vrot.lane.b32.xlu0 %v4902_v24, %s4462_s25  ;;  %v4906_v25 = vpop.f32.mrb[19].mxu1 }
0x120d   :  { %v4908_v43 = vpop.f32.mrb[20].mxu1 }
0x120e   :  { %2103 = vrot.lane.b32.xlu1 %v4908_v43, %s4462_s25  ;;  %v4912_v15 = vpop.f32.mrb[21].mxu1 }
0x127c   :  { %v2027_v26 = vpop.permute.xlu0 %2026 }
0x127d   :  { %4112 = vmatpush3.xpose.msk.msra.mxu0 %vm184_vm2, %v2027_v26 }
0x127e   :  { %4121 = vmatprep.subr.mxu0 %v4460_v21 }
0x1280   :  { %4114 = vmatmul.mubr.msk.f32.vlgmr.msra.gmra.mrb[24].mxu0 %vm184_vm2, %v4902_v24  ;;  %v2104_v27 = vpop.permute.xlu1 %2103 }
0x1281   :  { %4117 = vmatpush3.xpose.msk.msra.mxu1 %vm184_vm2, %v2104_v27  ;;  %4122 = vmatpush3.msra.mxu0 %v4906_v25 }
0x1282   :  { %4126 = vmatprep.subr.mxu1 %v4460_v21  ;;  %4123 = vmatprep.mubr.msk.f32.mxu0 %vm4461_vm1, %v4460_v21 }
0x1283   :  { %4131 = vmatprep.subr.mxu0 %v4460_v21 }
0x1284   :  { %4119 = vmatmul.mubr.msk.f32.vlgmr.msra.gmra.mrb[22].mxu1 %vm184_vm2, %v4908_v43 }
0x1285   :  { %4127 = vmatpush3.msra.mxu1 %v4912_v15  ;;  %4128 = vmatprep.mubr.msk.f32.mxu1 %vm4461_vm1, %v4460_v21 }
0x1286   :  { %4136 = vmatprep.subr.mxu1 %v4460_v21 }
0x1353   :  { %v2098_v28 = vpop.f32.mrb[24].mxu0 }
0x1354   :  { %v2179_v29 = vmul.f32 0.25, %v2098_v28  ;;  %v4115_v31 = vpop.f32.mrb[25].mxu0 }
0x1356   :  { %v2181_v32 = vsel %vm338_vm3, %v2179_v29, -inf }
0x1357   :  { %2182 = vmax.xlane.f32.xlu1 %v2181_v32  ;;  %v2175_v33 = vpop.f32.mrb[22].mxu1 }
0x1358   :  { %v2180_v34 = vmul.f32 0.25, %v2175_v33  ;;  %v4120_v35 = vpop.f32.mrb[23].mxu1 }
0x135a   :  { %v2184_v36 = vsel %vm338_vm3, %v2180_v34, -inf }
0x135b   :  { %2185 = vmax.xlane.f32.xlu0 %v2184_v36 }
0x1368   :  { %2429 = vrot.lane.b32.xlu1 %v4908_v43, %s4463_s26 }
0x136c   :  { %2349 = vrot.lane.b32.xlu1 %v4902_v24, %s4464_s27 }
0x13e4   :  { %v2183_v37 = vpop.xlane.xlu1 %2182 }
0x13e5   :  { %v2187_v1 = vsub.f32 %v2179_v29, %v2183_v37 }
0x13e7   :  { %v2189_v38 = vmul.f32 1.442695, %v2187_v1 }
0x13e8   :  { %v2186_v0 = vpop.xlane.xlu0 %2185  ;;  %v2430_v46 = vpop.permute.xlu1 %2429 }
0x13e9   :  { %4396 = vpow2.f32 %v2189_v38  ;;  %v2188_v39 = vsub.f32 %v2180_v34, %v2186_v0 }
0x13eb   :  { %v2191_v40 = vmul.f32 1.442695, %v2188_v39 }
0x13ec   :  { %v2350_v51 = vpop.permute.xlu1 %2349 }
0x13ed   :  { %4398 = vpow2.f32 %v2191_v40 }
0x13f3   :  { %v4397_v41 = vpop.eup %4396 }
0x13f4   :  { %v2193_v48 = vsel %vm338_vm3, %v4397_v41, 0.0 }
0x13f5   :  { %2194 = vadd.xlane.f32.xlu0 %v2193_v48 }
0x13f7   :  { %v4399_v49 = vpop.eup %4398 }
0x13f8   :  { %v2196_v50 = vsel %vm338_vm3, %v4399_v49, 0.0 }
0x13f9   :  { %2197 = vadd.xlane.f32.xlu1 %v2196_v50 }
0x140a   :  { %2427 = vrot.lane.b32.xlu1 %v4908_v43, %s4464_s27 }
0x140b   :  { %2351 = vrot.lane.b32.xlu0 %v4902_v24, %s4463_s26 }
0x1482   :  { %v2195_v52 = vpop.xlane.xlu0 %2194 }
0x1483   :  { %4400 = vrcp.f32 %v2195_v52 }
0x1486   :  { %v2198_v53 = vpop.xlane.xlu1 %2197  ;;  %v2352_v55 = vpop.permute.xlu0 %2351 }
0x1487   :  { %4402 = vrcp.f32 %v2198_v53 }
0x148a   :  { %v2428_v57 = vpop.permute.xlu1 %2427 }
0x148d   :  { %v4401_v30 = vpop.eup %4400 }
0x148e   :  { %v2200_v54 = vmul.f32 %v4401_v30, %v4397_v41 }
0x1490   :  { %4124 = vmatmul.mubr.msk.f32.vlgmr.msra.gmra.mrb[26].mxu0 %vm338_vm3, %v2200_v54 }
0x1491   :  { %v4403_v17 = vpop.eup %4402  ;;  %4132 = vmatpush3.xpose.msk.msra.mxu0 %vm184_vm2, %v2352_v55  ;;  %4133 = vmatprep.mubr.msk.f32.mxu0 %vm4461_vm1, %v4460_v21 }
0x1492   :  { %v2202_v56 = vmul.f32 %v4403_v17, %v4399_v49  ;;  %4141 = vmatprep.subr.mxu0 %v4460_v21 }
0x1494   :  { %4129 = vmatmul.mubr.msk.f32.vlgmr.msra.gmra.mrb[24].mxu1 %vm338_vm3, %v2202_v56  ;;  %4134 = vmatmul.mubr.msk.f32.vlgmr.msra.gmra.mrb[28].mxu0 %vm184_vm2, %v2350_v51 }
0x1495   :  { %4137 = vmatpush3.xpose.msk.msra.mxu1 %vm184_vm2, %v2430_v46  ;;  %4138 = vmatprep.mubr.msk.f32.mxu1 %vm4461_vm1, %v4460_v21 }
0x1496   :  { %4146 = vmatprep.subr.mxu1 %v4460_v21  ;;  %4143 = vmatprep.mubr.msk.f32.mxu0 %vm4461_vm1, %v4460_v21 }
0x1498   :  { %4139 = vmatmul.mubr.msk.f32.vlgmr.msra.gmra.mrb[26].mxu1 %vm184_vm2, %v2428_v57 }
0x1499   :  { %4148 = vmatprep.mubr.msk.f32.mxu1 %vm4461_vm1, %v4460_v21 }
0x1563   :  { %v4958_v58 = vpop.f32.mrb[26].mxu0 }
0x1564   :  { %v4125_v59 = vpop.f32.mrb[27].mxu0 }
0x1567   :  { %v4960_v44 = vpop.f32.mrb[24].mxu1  ;;  %v2423_v60 = vpop.f32.mrb[28].mxu0 }
0x1568   :  { %v2505_v61 = vmul.f32 0.25, %v2423_v60  ;;  %v4130_v62 = vpop.f32.mrb[25].mxu1  ;;  %v4135_v63 = vpop.f32.mrb[29].mxu0 }
0x156a   :  { %v2507_v2 = vsel %vm338_vm3, %v2505_v61, -inf }
0x156b   :  { %2508 = vmax.xlane.f32.xlu0 %v2507_v2  ;;  %v2501_v3 = vpop.f32.mrb[26].mxu1 }
0x156c   :  { %v2506_v4 = vmul.f32 0.25, %v2501_v3  ;;  %v4140_v5 = vpop.f32.mrb[27].mxu1 }
0x156e   :  { %v2510_v6 = vsel %vm338_vm3, %v2506_v4, -inf }
0x156f   :  { %2511 = vmax.xlane.f32.xlu1 %v2510_v6 }
0x1580   :  { %2607 = vrot.lane.b32.xlu1 %v4912_v15, %s4464_s27 }
0x1581   :  { %2530 = vrot.lane.b32.xlu0 %v4906_v25, %s4464_s27 }
0x1584   :  { %2685 = vrot.lane.b32.xlu1 %v4902_v24, %s4465_s28 }
0x1588   :  { %2763 = vrot.lane.b32.xlu1 %v4908_v43, %s4465_s28 }
0x158c   :  { %2761 = vrot.lane.b32.xlu1 %v4908_v43, %s4466_s29 }
0x15f8   :  { %v2509_v7 = vpop.xlane.xlu0 %2508 }
0x15f9   :  { %v2513_v8 = vsub.f32 %v2505_v61, %v2509_v7 }
0x15fb   :  { %v2515_v9 = vmul.f32 1.442695, %v2513_v8 }
0x15fc   :  { %v2531_v10 = vpop.permute.xlu0 %2530  ;;  %v2512_v11 = vpop.xlane.xlu1 %2511 }
0x15fd   :  { %4404 = vpow2.f32 %v2515_v9  ;;  %v2514_v12 = vsub.f32 %v2506_v4, %v2512_v11  ;;  %4142 = vmatpush3.msra.mxu0 %v2531_v10 }
0x15fe   :  { %4151 = vmatprep.subr.mxu0 %v4460_v21 }
0x15ff   :  { %v2517_v13 = vmul.f32 1.442695, %v2514_v12 }
0x1600   :  { %v2608_v45 = vpop.permute.xlu1 %2607 }
0x1601   :  { %4406 = vpow2.f32 %v2517_v13  ;;  %4147 = vmatpush3.msra.mxu1 %v2608_v45 }
0x1602   :  { %4156 = vmatprep.subr.mxu1 %v4460_v21 }
0x1604   :  { %v2686_v23 = vpop.permute.xlu1 %2685 }
0x1607   :  { %v4405_v14 = vpop.eup %4404 }
0x1608   :  { %v2519_v16 = vsel %vm338_vm3, %v4405_v14, 0.0  ;;  %v2764_v29 = vpop.permute.xlu1 %2763 }
0x1609   :  { %2520 = vadd.xlane.f32.xlu0 %v2519_v16 }
0x160b   :  { %v4407_v18 = vpop.eup %4406 }
0x160c   :  { %v2522_v19 = vsel %vm338_vm3, %v4407_v18, 0.0  ;;  %v2762_v33 = vpop.permute.xlu1 %2761 }
0x160d   :  { %2523 = vadd.xlane.f32.xlu0 %v2522_v19 }
0x1623   :  { %2683 = vrot.lane.b32.xlu0 %v4902_v24, %s4466_s29 }
0x1696   :  { %v2521_v20 = vpop.xlane.xlu0 %2520 }
0x1697   :  { %4408 = vrcp.f32 %v2521_v20 }
0x169a   :  { %v2524_v22 = vpop.xlane.xlu0 %2523 }
0x169b   :  { %4410 = vrcp.f32 %v2524_v22 }
0x169e   :  { %v2684_v32 = vpop.permute.xlu0 %2683 }
0x16a1   :  { %v4409_v26 = vpop.eup %4408 }
0x16a2   :  { %v2526_v27 = vmul.f32 %v4409_v26, %v4405_v14 }
0x16a4   :  { %4144 = vmatmul.mubr.msk.f32.vlgmr.msra.gmra.mrb[30].mxu0 %vm338_vm3, %v2526_v27 }
0x16a5   :  { %v4411_v28 = vpop.eup %4410  ;;  %4152 = vmatpush3.xpose.msk.msra.mxu0 %vm184_vm2, %v2686_v23  ;;  %4153 = vmatprep.mubr.msk.f32.mxu0 %vm4461_vm1, %v4460_v21 }
0x16a6   :  { %v2528_v31 = vmul.f32 %v4411_v28, %v4407_v18  ;;  %4161 = vmatprep.subr.mxu0 %v4460_v21 }
0x16a8   :  { %4149 = vmatmul.mubr.msk.f32.vlgmr.msra.gmra.mrb[28].mxu1 %vm338_vm3, %v2528_v31  ;;  %4154 = vmatmul.mubr.msk.f32.vlgmr.msra.gmra.mrb[32].mxu0 %vm184_vm2, %v2684_v32 }
0x16a9   :  { %4157 = vmatpush3.xpose.msk.msra.mxu1 %vm184_vm2, %v2764_v29  ;;  %4158 = vmatprep.mubr.msk.f32.mxu1 %vm4461_vm1, %v4460_v21 }
0x16aa   :  { %4166 = vmatprep.subr.mxu1 %v4460_v21  ;;  %4163 = vmatprep.mubr.msk.f32.mxu0 %vm4461_vm1, %v4460_v21 }
0x16ac   :  { %4159 = vmatmul.mubr.msk.f32.vlgmr.msra.gmra.mrb[30].mxu1 %vm184_vm2, %v2762_v33 }
0x16ad   :  { %4168 = vmatprep.mubr.msk.f32.mxu1 %vm4461_vm1, %v4460_v21 }
0x1777   :  { %v4996_v34 = vpop.f32.mrb[30].mxu0 }
0x1778   :  { %v4145_v35 = vpop.f32.mrb[31].mxu0 }
0x177b   :  { %v4998_v36 = vpop.f32.mrb[28].mxu1  ;;  %v2757_v37 = vpop.f32.mrb[32].mxu0 }
0x177c   :  { %v2839_v1 = vmul.f32 0.25, %v2757_v37  ;;  %v4150_v38 = vpop.f32.mrb[29].mxu1  ;;  %v4155_v0 = vpop.f32.mrb[33].mxu0 }
0x177d   :  { %v3831_v38 = vld [vmem:[%s5175_s4 + $0x48] sm:$0xff]  ;;  %v3832_v0 = vld [vmem:[%s5175_s4 + $0x50] sm:$0xff] }
0x177e   :  { %v2841_v39 = vsel %vm338_vm3, %v2839_v1, -inf }
0x177f   :  { %2842 = vmax.xlane.f32.xlu0 %v2841_v39  ;;  %v2835_v40 = vpop.f32.mrb[30].mxu1 }
0x1780   :  { %v2840_v41 = vmul.f32 0.25, %v2835_v40  ;;  %v4160_v48 = vpop.f32.mrb[31].mxu1  ;;  %v3833_v40 = vld [vmem:[%s5175_s4 + $0x58] sm:$0xff] }
0x1781   :  { %v3834_v48 = vld [vmem:[%s5175_s4 + $0x60] sm:$0xff] }
0x1782   :  { %v2844_v49 = vsel %vm338_vm3, %v2840_v41, -inf }
0x1783   :  { %2845 = vmax.xlane.f32.xlu1 %v2844_v49  ;;  %v3835_v49 = vld [vmem:[%s5175_s4 + $0x68] sm:$0xff] }
0x1794   :  { %2939 = vrot.lane.b32.xlu1 %v4912_v15, %s4466_s29 }
0x1795   :  { %2863 = vrot.lane.b32.xlu0 %v4906_v25, %s4466_s29 }
0x1798   :  { %3017 = vrot.lane.b32.xlu1 %v4902_v24, %s4467_s30 }
0x179c   :  { %3095 = vrot.lane.b32.xlu1 %v4908_v43, %s4467_s30 }
0x17a0   :  { %3093 = vrot.lane.b32.xlu1 %v4908_v43, %s4468_s13 }
0x180c   :  { %v2843_v50 = vpop.xlane.xlu0 %2842 }
0x180d   :  { %v2847_v46 = vsub.f32 %v2839_v1, %v2843_v50  ;;  %v4304_v50 = vpack.c.bf16 %v3835_v49, %v3834_v48  ;;  %v3855_v48 = vld [vmem:[%s5181_s10 + $0x48] sm:$0xff] }
0x180f   :  { %v2849_v51 = vmul.f32 1.442695, %v2847_v46  ;;  %v3836_v46 = vld [vmem:[%s5175_s4 + $0x70] sm:$0xff] }
0x1810   :  { %v2864_v52 = vpop.permute.xlu0 %2863  ;;  %v2846_v53 = vpop.xlane.xlu1 %2845 }
0x1811   :  { %4412 = vpow2.f32 %v2849_v51  ;;  %v2848_v30 = vsub.f32 %v2840_v41, %v2846_v53  ;;  %4162 = vmatpush3.msra.mxu0 %v2864_v52  ;;  %v4300_v41 = vpack.c.bf16 %v3833_v40, %v3832_v0  ;;  %v3837_v51 = vld [vmem:[%s5175_s4 + $0x78] sm:$0xff] }
0x1812   :  { %4171 = vmatprep.subr.mxu0 %v4460_v21  ;;  %v4308_v52 = vpack.c.bf16 %v3837_v51, %v3836_v46  ;;  %v3857_v46 = vld [vmem:[%s5181_s10 + $0x58] sm:$0xff] }
0x1813   :  { %v2851_v54 = vmul.f32 1.442695, %v2848_v30 }
0x1814   :  { %v2940_v55 = vpop.permute.xlu1 %2939 }
0x1815   :  { %4414 = vpow2.f32 %v2851_v54  ;;  %4167 = vmatpush3.msra.mxu1 %v2940_v55 }
0x1816   :  { %4176 = vmatprep.subr.mxu1 %v4460_v21 }
0x1818   :  { %v3018_v61 = vpop.permute.xlu1 %3017 }
0x181b   :  { %v4413_v17 = vpop.eup %4412 }
0x181c   :  { %v2853_v56 = vsel %vm338_vm3, %v4413_v17, 0.0  ;;  %v3096_v3 = vpop.permute.xlu1 %3095 }
0x181d   :  { %2854 = vadd.xlane.f32.xlu0 %v2853_v56 }
0x181f   :  { %v4415_v43 = vpop.eup %4414 }
0x1820   :  { %v2856_v57 = vsel %vm338_vm3, %v4415_v43, 0.0  ;;  %v3094_v5 = vpop.permute.xlu1 %3093 }
0x1821   :  { %2857 = vadd.xlane.f32.xlu0 %v2856_v57 }
0x1837   :  { %3015 = vrot.lane.b32.xlu0 %v4902_v24, %s4468_s13 }
0x18aa   :  { %v2855_v59 = vpop.xlane.xlu0 %2854 }
0x18ab   :  { %4416 = vrcp.f32 %v2855_v59 }
0x18ae   :  { %v2858_v60 = vpop.xlane.xlu0 %2857 }
0x18af   :  { %4418 = vrcp.f32 %v2858_v60 }
0x18b2   :  { %v3016_v24 = vpop.permute.xlu0 %3015 }
0x18b5   :  { %v4417_v62 = vpop.eup %4416 }
0x18b6   :  { %v2860_v63 = vmul.f32 %v4417_v62, %v4413_v17 }
0x18b8   :  { %4164 = vmatmul.mubr.msk.f32.vlgmr.msra.gmra.mrb[34].mxu0 %vm338_vm3, %v2860_v63 }
0x18b9   :  { %v4419_v2 = vpop.eup %4418  ;;  %4172 = vmatpush3.xpose.msk.msra.mxu0 %vm184_vm2, %v3018_v61  ;;  %4173 = vmatprep.mubr.msk.f32.mxu0 %vm4461_vm1, %v4460_v21 }
0x18ba   :  { %v2862_v4 = vmul.f32 %v4419_v2, %v4415_v43  ;;  %4181 = vmatprep.subr.mxu0 %v4460_v21 }
0x18bc   :  { %4169 = vmatmul.mubr.msk.f32.vlgmr.msra.gmra.mrb[32].mxu1 %vm338_vm3, %v2862_v4  ;;  %4174 = vmatmul.mubr.msk.f32.vlgmr.msra.gmra.mrb[36].mxu0 %vm184_vm2, %v3016_v24 }
0x18bd   :  { %4177 = vmatpush3.xpose.msk.msra.mxu1 %vm184_vm2, %v3096_v3  ;;  %4178 = vmatprep.mubr.msk.f32.mxu1 %vm4461_vm1, %v4460_v21 }
0x18be   :  { %4186 = vmatprep.subr.mxu1 %v4460_v21  ;;  %4183 = vmatprep.mubr.msk.f32.mxu0 %vm4461_vm1, %v4460_v21 }
0x18c0   :  { %4179 = vmatmul.mubr.msk.f32.vlgmr.msra.gmra.mrb[34].mxu1 %vm184_vm2, %v3094_v5 }
0x18c1   :  { %4188 = vmatprep.mubr.msk.f32.mxu1 %vm4461_vm1, %v4460_v21 }
0x198b   :  { %v2935_v6 = vpop.f32.mrb[34].mxu0 }
0x198c   :  { %v4165_v7 = vpop.f32.mrb[35].mxu0 }
0x198f   :  { %v3011_v8 = vpop.f32.mrb[32].mxu1  ;;  %v3089_v9 = vpop.f32.mrb[36].mxu0 }
0x1990   :  { %v3171_v10 = vmul.f32 0.25, %v3089_v9  ;;  %v4170_v11 = vpop.f32.mrb[33].mxu1  ;;  %v4175_v12 = vpop.f32.mrb[37].mxu0 }
0x1992   :  { %v3173_v13 = vsel %vm338_vm3, %v3171_v10, -inf }
0x1993   :  { %3174 = vmax.xlane.f32.xlu0 %v3173_v13  ;;  %v3167_v45 = vpop.f32.mrb[34].mxu1 }
0x1994   :  { %v3172_v14 = vmul.f32 0.25, %v3167_v45  ;;  %v4180_v16 = vpop.f32.mrb[35].mxu1 }
0x1996   :  { %v3176_v18 = vsel %vm338_vm3, %v3172_v14, -inf }
0x1997   :  { %3177 = vmax.xlane.f32.xlu1 %v3176_v18 }
0x19a8   :  { %3271 = vrot.lane.b32.xlu1 %v4912_v15, %s4468_s13 }
0x19ac   :  { %3349 = vrot.lane.b32.xlu1 %v4996_v34, %s4467_s30 }
0x19b0   :  { %3351 = vrot.lane.b32.xlu1 %v4998_v36, %s4467_s30 }
0x19b4   :  { %3359 = vrot.lane.b32.xlu1 %v3011_v8, %s4465_s28 }
0x1a20   :  { %v3175_v21 = vpop.xlane.xlu0 %3174 }
0x1a21   :  { %v3179_v19 = vsub.f32 %v3171_v10, %v3175_v21 }
0x1a23   :  { %v3181_v20 = vmul.f32 1.442695, %v3179_v19  ;;  %v3846_v19 = vld [vmem:[%s5179_s8 + $0x20] sm:$0xff] }
0x1a24   :  { %v3178_v22 = vpop.xlane.xlu1 %3177 }
0x1a25   :  { %4420 = vpow2.f32 %v3181_v20  ;;  %v3180_v23 = vsub.f32 %v3172_v14, %v3178_v22  ;;  %v3847_v20 = vld [vmem:[%s5179_s8 + $0x28] sm:$0xff] }
0x1a26   :  { %v4312_v22 = vpack.c.bf16 %v3847_v20, %v3846_v19 }
0x1a27   :  { %v3183_v26 = vmul.f32 1.442695, %v3180_v23  ;;  %v3848_v23 = vld [vmem:[%s5179_s8 + $0x30] sm:$0xff] }
0x1a28   :  { %v3272_v27 = vpop.permute.xlu1 %3271 }
0x1a29   :  { %4422 = vpow2.f32 %v3183_v26  ;;  %4187 = vmatpush3.msra.mxu1 %v3272_v27  ;;  %v3849_v26 = vld [vmem:[%s5179_s8 + $0x38] sm:$0xff] }
0x1a2a   :  { %4313 = vmatprep.subr.bf16.mxu1 %v4312_v22  ;;  %v4316_v27 = vpack.c.bf16 %v3849_v26, %v3848_v23 }
0x1a2c   :  { %v3350_v17 = vpop.permute.xlu1 %3349 }
0x1a2d   :  { %v3371_v57 = vsel %vm184_vm2, %v4958_v58, %v3350_v17  ;;  %v3839_v58 = vld [vmem:[%s5176_s5 + $0x1] ss:$0 sm:$0xff] }
0x1a2f   :  { %v4421_v28 = vpop.eup %4420 }
0x1a30   :  { %v3185_v15 = vsel %vm338_vm3, %v4421_v28, 0.0  ;;  %v3352_v56 = vpop.permute.xlu1 %3351 }
0x1a31   :  { %3186 = vadd.xlane.f32.xlu0 %v3185_v15  ;;  %v3372_v63 = vsel %vm184_vm2, %v4960_v44, %v3352_v56  ;;  %v3851_v56 = vld [vmem:[%s5180_s9 + $0x1] ss:$0 sm:$0xff] }
0x1a33   :  { %v4423_v29 = vpop.eup %4422 }
0x1a34   :  { %v3188_v31 = vsel %vm338_vm3, %v4423_v29, 0.0  ;;  %v3360_v59 = vpop.permute.xlu1 %3359 }
0x1a35   :  { %3189 = vadd.xlane.f32.xlu0 %v3188_v31  ;;  %v3374_v2 = vsel %vm46_vm0, %v3372_v63, %v3360_v59 }
0x1a4b   :  { %3195 = vrot.lane.b32.xlu0 %v4906_v25, %s4468_s13  ;;  %v3830_v25 = vld [vmem:[%s5175_s4 + $0x40] sm:$0xff] }
0x1a4c   :  { %v4296_v39 = vpack.c.bf16 %v3831_v38, %v3830_v25 }
0x1a4f   :  { %3357 = vrot.lane.b32.xlu0 %v2935_v6, %s4465_s28 }
0x1abe   :  { %v3187_v32 = vpop.xlane.xlu0 %3186 }
0x1abf   :  { %4424 = vrcp.f32 %v3187_v32 }
0x1ac2   :  { %v3190_v33 = vpop.xlane.xlu0 %3189 }
0x1ac3   :  { %4426 = vrcp.f32 %v3190_v33 }
0x1ac6   :  { %v3196_v34 = vpop.permute.xlu0 %3195 }
0x1ac7   :  { %4182 = vmatpush3.msra.mxu0 %v3196_v34 }
0x1ac8   :  { %4297 = vmatprep.subr.bf16.mxu0 %v4296_v39 }
0x1ac9   :  { %v4425_v35 = vpop.eup %4424 }
0x1aca   :  { %v3192_v36 = vmul.f32 %v4425_v35, %v4421_v28  ;;  %v3358_v43 = vpop.permute.xlu0 %3357  ;;  %v3844_v35 = vld [vmem:[%s5177_s6 + $0x1] ss:$0 sm:$0xff] }
0x1acb   :  { %v3373_v60 = vsel %vm46_vm0, %v3371_v57, %v3358_v43 }
0x1acc   :  { %4184 = vmatmul.mubr.msk.f32.vlgmr.msra.gmra.mrb[38].mxu0 %vm338_vm3, %v3192_v36 }
0x1acd   :  { %v4427_v37 = vpop.eup %4426  ;;  %4299 = vmatpush3.bf16.msra.mxu0 %v4296_v39 }
0x1ace   :  { %v3194_v1 = vmul.f32 %v4427_v37, %v4423_v29  ;;  %4301 = vmatprep.subr.bf16.mxu0 %v4300_v41  ;;  %v3845_v37 = vld [vmem:[%s5178_s7 + $0x1] ss:$0 sm:$0xff] }
0x1ad0   :  { %4189 = vmatmul.mubr.msk.f32.vlgmr.msra.gmra.mrb[36].mxu1 %vm338_vm3, %v3194_v1 }
0x1ad1   :  { %4303 = vmatpush3.bf16.msra.mxu0 %v4300_v41  ;;  %4315 = vmatpush3.bf16.msra.mxu1 %v4312_v22  ;;  %v3854_v41 = vld [vmem:[%s5181_s10 + $0x40] sm:$0xff] }
0x1ad2   :  { %4305 = vmatprep.subr.bf16.mxu0 %v4304_v50  ;;  %4317 = vmatprep.subr.bf16.mxu1 %v4316_v27  ;;  %v4320_v49 = vpack.c.bf16 %v3855_v48, %v3854_v41 }
0x1ad5   :  { %4307 = vmatpush3.bf16.msra.mxu0 %v4304_v50  ;;  %4319 = vmatpush3.bf16.msra.mxu1 %v4316_v27  ;;  %v3856_v50 = vld [vmem:[%s5181_s10 + $0x50] sm:$0xff] }
0x1ad6   :  { %4309 = vmatprep.subr.bf16.mxu0 %v4308_v52  ;;  %v4324_v51 = vpack.c.bf16 %v3857_v46, %v3856_v50  ;;  %4321 = vmatprep.subr.bf16.mxu1 %v4320_v49 }
0x1ad9   :  { %4311 = vmatpush3.bf16.msra.mxu0 %v4308_v52  ;;  %v3858_v52 = vld [vmem:[%s5181_s10 + $0x60] sm:$0xff] }
0x1b9f   :  { %v3267_v53 = vpop.f32.mrb[38].mxu0 }
0x1ba0   :  { %3365 = vrot.lane.b32.xlu0 %v3267_v53, %s4463_s26  ;;  %v4185_v30 = vpop.f32.mrb[39].mxu0  ;;  %v3859_v53 = vld [vmem:[%s5181_s10 + $0x68] sm:$0xff] }
0x1ba1   :  { %v4328_v30 = vpack.c.bf16 %v3859_v53, %v3858_v52 }
0x1ba3   :  { %v3343_v54 = vpop.f32.mrb[36].mxu1 }
0x1ba4   :  { %3367 = vrot.lane.b32.xlu1 %v3343_v54, %s4463_s26  ;;  %v4190_v55 = vpop.f32.mrb[37].mxu1  ;;  %v3860_v54 = vld [vmem:[%s5181_s10 + $0x70] sm:$0xff] }
0x1ba5   :  { %v3861_v55 = vld [vmem:[%s5181_s10 + $0x78] sm:$0xff] }
0x1ba6   :  { %v4332_v17 = vpack.c.bf16 %v3861_v55, %v3860_v54 }
0x1c12   :  { %v3366_v61 = vpop.permute.xlu0 %3365 }
0x1c13   :  { %v3375_v62 = vsel %vm1533_vm4, %v3373_v60, %v3366_v61 }
0x1c14   :  { %4207 = vmatprep.mubr.msk.f32.mxu0 %vm1551_vm5, %v3375_v62 }
0x1c16   :  { %v3368_v3 = vpop.permute.xlu1 %3367 }
0x1c17   :  { %v3376_v4 = vsel %vm1533_vm4, %v3374_v2, %v3368_v3 }
0x1c18   :  { %4208 = vmatmul.mubr.msk.f32.vlgmr.msra.gmra.mrb[40].mxu0 %vm1551_vm5, %v3376_v4 }
0x1ceb   :  { %v4209_v24 = vpop.f32.mrb[40].mxu0 }
0x1cec   :  { %v3472_v5 = vadd.f32 %v4209_v24, %v3839_v58  ;;  %v3466_v6 = vpop.f32.mrb[41].mxu0 }
0x1ced   :  { %v3467_v7 = vadd.f32 %v3839_v58, %v3466_v6 }
0x1cee   :  { %v5090_v8 = vadd.f32 %v3472_v5, %v4853_v42 }
0x1cef   :  { %v5093_v44 = vadd.f32 %v3467_v7, %v4856_v47 }
0x1cf0   :  { %v3484_v9 = vsel %vm46_vm0, %v5090_v8, 0.0 }
0x1cf1   :  { %3485 = vadd.xlane.f32.xlu1 %v3484_v9  ;;  %v3481_v10 = vsel %vm46_vm0, %v5093_v44, 0.0 }
0x1cf2   :  { %3482 = vadd.xlane.f32.xlu0 %v3481_v10 }
0x1d7e   :  { %v3486_v11 = vpop.xlane.xlu1 %3485 }
0x1d7f   :  { %v3488_v12 = vmul.f32 0.03125, %v3486_v11  ;;  %v3483_v13 = vpop.xlane.xlu0 %3482 }
0x1d80   :  { %v3487_v45 = vmul.f32 0.03125, %v3483_v13 }
0x1d81   :  { %v3490_v14 = vsub.f32 %v5090_v8, %v3488_v12 }
0x1d82   :  { %v3489_v42 = vsub.f32 %v5093_v44, %v3487_v45 }
0x1d83   :  { %v3492_v18 = vmul.f32 %v3490_v14, %v3490_v14 }
0x1d84   :  { %v3491_v16 = vmul.f32 %v3489_v42, %v3489_v42 }
0x1d85   :  { %v3496_v21 = vsel %vm46_vm0, %v3492_v18, 0.0 }
0x1d86   :  { %v3493_v47 = vsel %vm46_vm0, %v3491_v16, 0.0 }
0x1d87   :  { %3494 = vadd.xlane.f32.xlu0 %v3493_v47 }
0x1d8b   :  { %3497 = vadd.xlane.f32.xlu0 %v3496_v21 }
0x1e14   :  { %v3495_v28 = vpop.xlane.xlu0 %3494 }
0x1e15   :  { %v3499_v15 = vmul.f32 0.03125, %v3495_v28 }
0x1e17   :  { %v3501_v29 = vadd.f32 1e-05, %v3499_v15 }
0x1e18   :  { %v3498_v31 = vpop.xlane.xlu0 %3497 }
0x1e19   :  { %4428 = vrsqrt.f32 %v3501_v29  ;;  %v3500_v32 = vmul.f32 0.03125, %v3498_v31 }
0x1e1b   :  { %v3502_v33 = vadd.f32 1e-05, %v3500_v32 }
0x1e1d   :  { %4430 = vrsqrt.f32 %v3502_v33 }
0x1e23   :  { %v4429_v34 = vpop.eup %4428 }
0x1e24   :  { %v3505_v36 = vmul.f32 %v4429_v34, %v3489_v42  ;;  %v3863_v42 = vld [vmem:[%s5182_s11 + $0x1] ss:$0 sm:$0xff] }
0x1e26   :  { %v3513_v1 = vmul.f32 %v3844_v35, %v3505_v36 }
0x1e27   :  { %v4431_v25 = vpop.eup %4430 }
0x1e28   :  { %v3506_v38 = vmul.f32 %v4431_v25, %v3490_v14  ;;  %v3521_v0 = vadd.f32 %v3845_v37, %v3513_v1 }
0x1e2a   :  { %v3514_v39 = vmul.f32 %v3844_v35, %v3506_v38  ;;  %4218 = vmatprep.mubr.msk.f32.mxu1 %vm46_vm0, %v3521_v0 }
0x1e2c   :  { %v3522_v40 = vadd.f32 %v3845_v37, %v3514_v39 }
0x1e2e   :  { %4219 = vmatmul.mubr.msk.f32.vlgmr.msra.gmra.mrb[38].mxu1 %vm46_vm0, %v3522_v40 }
0x1e2f   :  { %4323 = vmatpush3.bf16.msra.mxu1 %v4320_v49 }
0x1e30   :  { %4325 = vmatprep.subr.bf16.mxu1 %v4324_v51 }
0x1e33   :  { %4327 = vmatpush3.bf16.msra.mxu1 %v4324_v51 }
0x1e34   :  { %4329 = vmatprep.subr.bf16.mxu1 %v4328_v30 }
0x1e37   :  { %4331 = vmatpush3.bf16.msra.mxu1 %v4328_v30 }
0x1e38   :  { %4333 = vmatprep.subr.bf16.mxu1 %v4332_v17 }
0x1e3b   :  { %4335 = vmatpush3.bf16.msra.mxu1 %v4332_v17 }
0x1f01   :  { %v4220_v43 = vpop.f32.mrb[38].mxu1 }
0x1f02   :  { %v3614_v57 = vadd.f32 %v4220_v43, %v3851_v56  ;;  %v3608_v59 = vpop.f32.mrb[39].mxu1 }
0x1f03   :  { %v3609_v60 = vadd.f32 %v3851_v56, %v3608_v59 }
0x1f04   :  { %v3620_v61 = vmul.f32 0.044715, %v3614_v57  ;;  %v3618_v13 = vmul.f32 0.5, %v3614_v57 }
0x1f05   :  { %v3619_v62 = vmul.f32 0.044715, %v3609_v60  ;;  %v3617_v11 = vmul.f32 0.5, %v3609_v60 }
0x1f06   :  { %v3622_v63 = vmul.f32 %v3620_v61, %v3614_v57 }
0x1f07   :  { %v3621_v2 = vmul.f32 %v3619_v62, %v3609_v60 }
0x1f08   :  { %v3624_v3 = vmul.f32 %v3622_v63, %v3614_v57 }
0x1f09   :  { %v3623_v4 = vmul.f32 %v3621_v2, %v3609_v60 }
0x1f0a   :  { %v3626_v58 = vadd.f32 %v3624_v3, %v3614_v57 }
0x1f0b   :  { %v3625_v24 = vadd.f32 %v3623_v4, %v3609_v60 }
0x1f0c   :  { %v3628_v5 = vmul.f32 0.7978846, %v3626_v58 }
0x1f0d   :  { %v3627_v6 = vmul.f32 0.7978846, %v3625_v24 }
0x1f0e   :  { %4432 = vtanh.f32 %v3628_v5 }
0x1f0f   :  { %4434 = vtanh.f32 %v3627_v6 }
0x1f18   :  { %v4433_v7 = vpop.eup %4432 }
0x1f19   :  { %v4435_v9 = vpop.eup %4434  ;;  %v3632_v10 = vadd.f32 1.0, %v4433_v7 }
0x1f1a   :  { %v3631_v12 = vadd.f32 1.0, %v4435_v9 }
0x1f1b   :  { %v3634_v14 = vmul.f32 %v3632_v10, %v3618_v13 }
0x1f1c   :  { %v3633_v45 = vmul.f32 %v3631_v12, %v3617_v11 }
0x1f1e   :  { %4237 = vmatprep.mubr.msk.f32.mxu1 %vm1551_vm5, %v3633_v45 }
0x1f1f   :  { %4238 = vmatmul.mubr.msk.f32.vlgmr.msra.gmra.mrb[40].mxu1 %vm1551_vm5, %v3634_v14 }
0x1ff2   :  { %v4239_v16 = vpop.f32.mrb[40].mxu1 }
0x1ff3   :  { %v3730_v47 = vadd.f32 %v4239_v16, %v3863_v42  ;;  %v3724_v18 = vpop.f32.mrb[41].mxu1 }
0x1ff4   :  { %v3725_v21 = vadd.f32 %v3863_v42, %v3724_v18 }
0x1ff5   :  { %v3734_v19 = vadd.f32 %v3730_v47, %v5090_v8 }
0x1ff6   :  { %v3733_v20 = vadd.f32 %v3725_v21, %v5093_v44 }
0x1ff7   :  { %3736 = vst.msk [vmem:[#allocation2 + $0x8] sm:$0xff] %vm46_vm0, %v3734_v19 }
0x1ff8   :  { %3735 = vst.msk [vmem:[#allocation2] sm:$0xff] %vm46_vm0, %v3733_v20 }
0x1ff9   :  { %4447 = shalt.err (!%p4444_p4)
}
0x1ffa   :  { %s4448_s2 = scalar_lea.hbm %s5183_s12, 256 }
0x1ffb   :  { %p4449_p5 = scmp.ne.s32.totalorder %s5183_s12, %s4448_s2  ;;  %p4452_p6 = scmp.lt.u32.totalorder %s4448_s2, %s5183_s12 }
0x1ffd   :  { %p4454_p7 = pnand %p4452_p6, %p4449_p5 }
0x1fff   :  { %4457 = shalt.err (!%p4454_p7)
}
0x2000   :  { %s4470_s8 = smov 128   ;;  %s4471_s30 = smov 8  }
0x2001   :  { %3748 = dma.vmem_to_hbm [thread:$0]  %s3743_s3, 256, %s5183_s12, [#allocation3], %s4470_s8, %s4470_s8, %s4471_s30  }
0x2002   :  { %4458 = dma.done.wait [#allocation3], 256  }
0x2003   :  { %4459 = vsyncadd [#allocation3], 4294967040 }
0x2004   :  { %3752 = vsyncpa [#allocation3], 1 }

</bundles_post_ra>
